<compile_context>
chip_gen: v7x
topology: tpu7x:2x2x1
jax: 0.10.0
libtpu: 0.0.40
codegen_flags: <defaults>
</compile_context>

<pallas_src>
import functools

import jax
import jax.numpy as jnp
from jax.experimental import pallas as pl
from jax.experimental.pallas import tpu as pltpu


def _make_kernel(scale, C, H, W, L, use_im2col):
    """Kernel body for one grid step operating on a [scale, C, L] tile."""
    # Static per-tap flat lane shifts, tap order (kh-major, kw-minor) matching
    # the weight layout built in the wrapper.  We want shifted[p] = x[p + d];
    # with roll semantics rolled[p] = x[(p - shift) mod L] that is shift = -d.
    tap_shifts = []
    for kh in range(3):
        for kw in range(3):
            d = (kh - 1) * W + (kw - 1)
            tap_shifts.append((-d) % L)

    def kernel(w_ref, b_ref, m_ref, x_ref, o_ref):
        # w_ref: [scale-1, 9, C, C] bf16  (or [scale-1, C, 9C] if use_im2col)
        # b_ref: [scale-1, C, 1]    f32   folded BN bias
        # m_ref: [9, L]             f32   0/1 per-tap edge masks (lane axis)
        # x_ref / o_ref: [1, scale, C, L] lane-dense activations
        masks = m_ref[...]                                  # one load per step
        mask_rows = [masks[t:t + 1] for t in range(9)]      # hoisted, reused

        def taps(x_sub):
            for t, shift in enumerate(tap_shifts):
                if shift == 0:                   # center tap: no shift / mask
                    yield t, x_sub
                else:
                    rolled = pltpu.roll(x_sub, shift=shift, axis=1)   # XLU
                    yield t, rolled * mask_rows[t]   # zero wrapped edge lanes

        def conv_bn_relu(x_sub, layer):
            if use_im2col:                       # C % 8 == 0: aligned concat
                cols = jnp.concatenate(
                    [p.astype(jnp.bfloat16) for _, p in taps(x_sub)], axis=0)
                acc = jnp.dot(w_ref[layer], cols,
                              preferred_element_type=jnp.float32)     # MXU
            else:                                # tiny C: 9 per-tap matmuls
                acc = None
                for t, p in taps(x_sub):
                    y_t = jnp.dot(w_ref[layer, t], p.astype(jnp.bfloat16),
                                  preferred_element_type=jnp.float32)  # MXU
                    acc = y_t if acc is None else acc + y_t
            return jnp.maximum(acc + b_ref[layer], 0.0)               # BN+ReLU

        # identity subgroup: one aligned, lane-dense pass-through store
        o_ref[0, 0] = x_ref[0, 0].astype(o_ref.dtype)

        prev = None
        for s in range(1, scale):
            x_sub = x_ref[0, s].astype(jnp.float32)          # [C, L]
            if prev is not None:
                x_sub = x_sub + prev                         # residual chain
            prev = conv_bn_relu(x_sub, s - 1)
            o_ref[0, s] = prev.astype(o_ref.dtype)           # aligned store

    return kernel


@functools.partial(jax.jit, static_argnames=("scale", "batch_block"))
def res2net_block(x, w, gamma, beta, mean, var, *, scale=4, eps=1e-5,
                  batch_block=None):
    """Res2NetBlock forward (eval-mode BN), stride=1, groups=1.

    x: [N, planes, H, W];  w: [scale-1, C, C, 3, 3];  BN params: [scale-1, C].
    """
    N, planes, H, W = x.shape
    assert scale >= 2 and planes % scale == 0, (
        "lane-dense layout requires planes % scale == 0")
    # TODO(synk): support the PyTorch remainder split (planes % scale != 0,
    # extra channels on the identity chunk) — needs an uneven first chunk.
    C = planes // scale
    HW = H * W

    if batch_block is None:
        # Keep >= 2 grid steps so the "parallel" axis feeds both v7x TCs.
        # Single-TC v5e/v6e: pass batch_block=N to collapse the grid.
        batch_block = next(d for d in range(max(1, N // 2), 0, -1)
                           if N % d == 0)
    assert N % batch_block == 0, "batch_block must divide N"
    G = N // batch_block
    L = batch_block * HW

    use_im2col = (C % 8 == 0)
    kernel = _make_kernel(scale, C, H, W, L, use_im2col)

    # ---- fold inference BatchNorm into conv weights / bias (wrapper glue) ---
    a = gamma / jnp.sqrt(var + eps)                       # [layers, C]
    bias = (beta - mean * a).astype(jnp.float32)
    w_s = w.astype(jnp.float32) * a[:, :, None, None, None]   # scale out-chan
    if use_im2col:
        # column index = (kh*3+kw)*C + ci  -> matches kernel concat row order
        w_arr = jnp.transpose(w_s, (0, 1, 3, 4, 2)).reshape(
            scale - 1, C, 9 * C).astype(jnp.bfloat16)
    else:
        # [layer, kh*3+kw, co, ci]          -> per-tap [C, C] matmul weights
        w_arr = jnp.transpose(w_s, (0, 3, 4, 1, 2)).reshape(
            scale - 1, 9, C, C).astype(jnp.bfloat16)
    w_ndim = w_arr.ndim
    b_arr = bias.reshape(scale - 1, C, 1)

    # ---- per-tap 0/1 edge masks on the flattened, image-tiled lane axis -----
    rows = jnp.arange(HW, dtype=jnp.int32) // W
    cols = jnp.arange(HW, dtype=jnp.int32) % W
    mask_list = []
    for kh in range(3):
        for kw in range(3):
            dh, dw = kh - 1, kw - 1
            valid = jnp.ones((HW,), dtype=bool)
            if dh == -1:
                valid &= rows >= 1
            elif dh == 1:
                valid &= rows <= H - 2
            if dw == -1:
                valid &= cols >= 1
            elif dw == 1:
                valid &= cols <= W - 2
            mask_list.append(valid.astype(jnp.float32))
    # Tiling with period HW also zeroes cross-image roll wrap.
    m_arr = jnp.tile(jnp.stack(mask_list, axis=0), (1, batch_block))  # [9, L]

    # ---- activations: [N, planes, H, W] -> [G, scale, C, batch_block*HW] ----
    x_lane = jnp.transpose(
        x.reshape(G, batch_block, scale, C, HW), (0, 2, 3, 1, 4)
    ).reshape(G, scale, C, L)

    out = pl.pallas_call(
        kernel,
        out_shape=jax.ShapeDtypeStruct((G, scale, C, L), x.dtype),
        grid_spec=pltpu.PrefetchScalarGridSpec(
            num_scalar_prefetch=0,
            grid=(G,),
            in_specs=[
                pl.BlockSpec(w_arr.shape, lambda g: (0,) * w_ndim),
                pl.BlockSpec((scale - 1, C, 1), lambda g: (0, 0, 0)),
                pl.BlockSpec((9, L), lambda g: (0, 0)),
                pl.BlockSpec((1, scale, C, L), lambda g: (g, 0, 0, 0)),
            ],
            out_specs=pl.BlockSpec((1, scale, C, L), lambda g: (g, 0, 0, 0)),
        ),
        compiler_params=pltpu.CompilerParams(
            dimension_semantics=("parallel",),
            vmem_limit_bytes=32 * 1024 * 1024),
    )(w_arr, b_arr, m_arr, x_lane)

    # invert the lane-batching transpose
    out = jnp.transpose(out.reshape(G, scale, C, batch_block, HW),
                        (0, 3, 1, 2, 4))
    return out.reshape(N, planes, H, W)


def reference(x, w, gamma, beta, mean, var, scale=4, eps=1e-5):
    """Pure-JAX reference matching the PyTorch forward (BN in eval mode)."""
    planes = x.shape[1]
    ch_per_sub = planes // scale
    ch_res = planes % scale
    chunks = [ch_per_sub * i + ch_res for i in range(1, scale + 1)]

    def block(xs, l):
        y = jax.lax.conv_general_dilated(
            xs, w[l], window_strides=(1, 1), padding=((1, 1), (1, 1)),
            dimension_numbers=("NCHW", "OIHW", "NCHW"))
        a = gamma[l] / jnp.sqrt(var[l] + eps)
        b = beta[l] - mean[l] * a
        y = y * a[None, :, None, None] + b[None, :, None, None]
        return jnp.maximum(y, 0.0)

    outs = [x[:, :chunks[0]]]
    prev = block(x[:, chunks[0]:chunks[1]], 0)
    outs.append(prev)
    for s in range(2, scale):
        sub = x[:, chunks[s - 1]:chunks[s]] + prev
        prev = block(sub, s - 1)
        outs.append(prev)
    return jnp.concatenate(outs, axis=1)


if __name__ == "__main__":
    N, planes, H, W = 2, 8, 16, 16
    scale = 4
    C = planes // scale

    key = jax.random.PRNGKey(0)
    kx, kw, kg, kb, km, kv = jax.random.split(key, 6)

    x = jax.random.normal(kx, (N, planes, H, W), jnp.float32)
    w = jax.random.normal(kw, (scale - 1, C, C, 3, 3), jnp.float32) * 0.2
    gamma = 1.0 + 0.1 * jax.random.normal(kg, (scale - 1, C), jnp.float32)
    beta = 0.1 * jax.random.normal(kb, (scale - 1, C), jnp.float32)
    mean = 0.1 * jax.random.normal(km, (scale - 1, C), jnp.float32)
    var = jax.random.uniform(kv, (scale - 1, C), jnp.float32, 0.5, 1.5)

    out = res2net_block(x, w, gamma, beta, mean, var, scale=scale)
    out = jax.block_until_ready(out)

    ref = reference(x, w, gamma, beta, mean, var, scale=scale)
    assert out.shape == (N, planes, H, W)
    # bf16 MXU operands are intentional (perf review); real layout/tap/weight
    # bugs produce O(1) errors, far above this tolerance.
    err = jnp.max(jnp.abs(out - ref))
    assert jnp.allclose(out, ref, atol=3e-2, rtol=2e-2), f"max err {err}"

    print("KERNEL_OK")
</pallas_src>

<mosaic_0001>
module attributes {stable_mosaic.version = 11 : i64} {
  func.func @kernel(%arg0: i32, %arg1: memref<3x9x2x2xbf16, #tpu.memory_space<vmem>>, %arg2: memref<3x2x1xf32, #tpu.memory_space<vmem>>, %arg3: memref<9x256xf32, #tpu.memory_space<vmem>>, %arg4: memref<1x4x2x256xf32, #tpu.memory_space<vmem>>, %arg5: memref<1x4x2x256xf32, #tpu.memory_space<vmem>>) attributes {dimension_semantics = [#tpu.dimension_semantics<parallel>], iteration_bounds = array<i64: 2>, scalar_prefetch = 0 : i64, scratch_operands = 0 : i64, tpu.core_type = #tpu.core_type<tc>, window_params = [{pipeline_mode = #tpu.pipeline_mode<synchronous>, transform_indices = @transform_0, window_bounds = array<i64: 3, 9, 2, 2>}, {pipeline_mode = #tpu.pipeline_mode<synchronous>, transform_indices = @transform_1, window_bounds = array<i64: 3, 2, 1>}, {pipeline_mode = #tpu.pipeline_mode<synchronous>, transform_indices = @transform_2, window_bounds = array<i64: 9, 256>}, {transform_indices = @transform_3, window_bounds = array<i64: 1, 4, 2, 256>}, {transform_indices = @transform_4, window_bounds = array<i64: 1, 4, 2, 256>}]} {
    %c0 = arith.constant 0 : index
    %c0_0 = arith.constant 0 : index
    %0 = vector.load %arg3[%c0, %c0_0] : memref<9x256xf32, #tpu.memory_space<vmem>>, vector<9x256xf32>
    %1 = vector.extract_strided_slice %0 {offsets = [0, 0], sizes = [1, 256], strides = [1, 1]} : vector<9x256xf32> to vector<1x256xf32>
    %2 = vector.extract_strided_slice %0 {offsets = [1, 0], sizes = [1, 256], strides = [1, 1]} : vector<9x256xf32> to vector<1x256xf32>
    %3 = vector.extract_strided_slice %0 {offsets = [2, 0], sizes = [1, 256], strides = [1, 1]} : vector<9x256xf32> to vector<1x256xf32>
    %4 = vector.extract_strided_slice %0 {offsets = [3, 0], sizes = [1, 256], strides = [1, 1]} : vector<9x256xf32> to vector<1x256xf32>
    %5 = vector.extract_strided_slice %0 {offsets = [5, 0], sizes = [1, 256], strides = [1, 1]} : vector<9x256xf32> to vector<1x256xf32>
    %6 = vector.extract_strided_slice %0 {offsets = [6, 0], sizes = [1, 256], strides = [1, 1]} : vector<9x256xf32> to vector<1x256xf32>
    %7 = vector.extract_strided_slice %0 {offsets = [7, 0], sizes = [1, 256], strides = [1, 1]} : vector<9x256xf32> to vector<1x256xf32>
    %8 = vector.extract_strided_slice %0 {offsets = [8, 0], sizes = [1, 256], strides = [1, 1]} : vector<9x256xf32> to vector<1x256xf32>
    %c0_1 = arith.constant 0 : index
    %c0_2 = arith.constant 0 : index
    %c0_3 = arith.constant 0 : index
    %c0_4 = arith.constant 0 : index
    %9 = vector.load %arg4[%c0_1, %c0_2, %c0_3, %c0_4] : memref<1x4x2x256xf32, #tpu.memory_space<vmem>>, vector<1x1x2x256xf32>
    %10 = vector.shape_cast %9 : vector<1x1x2x256xf32> to vector<2x256xf32>
    %c0_5 = arith.constant 0 : index
    %c0_6 = arith.constant 0 : index
    %c0_7 = arith.constant 0 : index
    %c0_8 = arith.constant 0 : index
    %11 = vector.load %arg5[%c0_5, %c0_6, %c0_7, %c0_8] : memref<1x4x2x256xf32, #tpu.memory_space<vmem>>, vector<1x1x2x256xf32>
    %12 = vector.shape_cast %11 : vector<1x1x2x256xf32> to vector<2x256xf32>
    %13 = vector.shape_cast %10 : vector<2x256xf32> to vector<1x1x2x256xf32>
    tpu.vector_store %arg5[%c0_5, %c0_6, %c0_7, %c0_8], %13 {strides = array<i32>} : memref<1x4x2x256xf32, #tpu.memory_space<vmem>>, vector<1x1x2x256xf32>,
    %c0_9 = arith.constant 0 : index
    %c1 = arith.constant 1 : index
    %c0_10 = arith.constant 0 : index
    %c0_11 = arith.constant 0 : index
    %14 = vector.load %arg4[%c0_9, %c1, %c0_10, %c0_11] : memref<1x4x2x256xf32, #tpu.memory_space<vmem>>, vector<1x1x2x256xf32>
    %15 = vector.shape_cast %14 : vector<1x1x2x256xf32> to vector<2x256xf32>
    %c17_i32 = arith.constant 17 : i32
    %16 = tpu.dynamic_rotate %15 by %c17_i32 dim 1 : vector<2x256xf32>, i32 -> vector<2x256xf32>
    %17 = vector.broadcast %1 : vector<1x256xf32> to vector<2x256xf32>
    %18 = arith.mulf %16, %17 : vector<2x256xf32>
    %c0_12 = arith.constant 0 : index
    %c0_13 = arith.constant 0 : index
    %c0_14 = arith.constant 0 : index
    %c0_15 = arith.constant 0 : index
    %19 = vector.load %arg1[%c0_12, %c0_13, %c0_14, %c0_15] : memref<3x9x2x2xbf16, #tpu.memory_space<vmem>>, vector<1x1x2x2xbf16>
    %20 = vector.shape_cast %19 : vector<1x1x2x2xbf16> to vector<2x2xbf16>
    %21 = arith.truncf %18 : vector<2x256xf32> to vector<2x256xbf16>
    %cst = arith.constant dense<0.000000e+00> : vector<2x256xf32>
    %22 = tpu.matmul %20, %21, %cst {dimension_numbers = #tpu.dot_dimension_numbers<[1], [0], [0], [1], [0, 0, 1, 1], [], []>} : vector<2x2xbf16>, vector<2x256xbf16>, vector<2x256xf32> -> vector<2x256xf32>
    %c16_i32 = arith.constant 16 : i32
    %23 = tpu.dynamic_rotate %15 by %c16_i32 dim 1 : vector<2x256xf32>, i32 -> vector<2x256xf32>
    %24 = vector.broadcast %2 : vector<1x256xf32> to vector<2x256xf32>
    %25 = arith.mulf %23, %24 : vector<2x256xf32>
    %c0_16 = arith.constant 0 : index
    %c1_17 = arith.constant 1 : index
    %c0_18 = arith.constant 0 : index
    %c0_19 = arith.constant 0 : index
    %26 = vector.load %arg1[%c0_16, %c1_17, %c0_18, %c0_19] : memref<3x9x2x2xbf16, #tpu.memory_space<vmem>>, vector<1x1x2x2xbf16>
    %27 = vector.shape_cast %26 : vector<1x1x2x2xbf16> to vector<2x2xbf16>
    %28 = arith.truncf %25 : vector<2x256xf32> to vector<2x256xbf16>
    %cst_20 = arith.constant dense<0.000000e+00> : vector<2x256xf32>
    %29 = tpu.matmul %27, %28, %cst_20 {dimension_numbers = #tpu.dot_dimension_numbers<[1], [0], [0], [1], [0, 0, 1, 1], [], []>} : vector<2x2xbf16>, vector<2x256xbf16>, vector<2x256xf32> -> vector<2x256xf32>
    %30 = arith.addf %22, %29 : vector<2x256xf32>
    %c15_i32 = arith.constant 15 : i32
    %31 = tpu.dynamic_rotate %15 by %c15_i32 dim 1 : vector<2x256xf32>, i32 -> vector<2x256xf32>
    %32 = vector.broadcast %3 : vector<1x256xf32> to vector<2x256xf32>
    %33 = arith.mulf %31, %32 : vector<2x256xf32>
    %c0_21 = arith.constant 0 : index
    %c2 = arith.constant 2 : index
    %c0_22 = arith.constant 0 : index
    %c0_23 = arith.constant 0 : index
    %34 = vector.load %arg1[%c0_21, %c2, %c0_22, %c0_23] : memref<3x9x2x2xbf16, #tpu.memory_space<vmem>>, vector<1x1x2x2xbf16>
    %35 = vector.shape_cast %34 : vector<1x1x2x2xbf16> to vector<2x2xbf16>
    %36 = arith.truncf %33 : vector<2x256xf32> to vector<2x256xbf16>
    %cst_24 = arith.constant dense<0.000000e+00> : vector<2x256xf32>
    %37 = tpu.matmul %35, %36, %cst_24 {dimension_numbers = #tpu.dot_dimension_numbers<[1], [0], [0], [1], [0, 0, 1, 1], [], []>} : vector<2x2xbf16>, vector<2x256xbf16>, vector<2x256xf32> -> vector<2x256xf32>
    %38 = arith.addf %30, %37 : vector<2x256xf32>
    %c1_i32 = arith.constant 1 : i32
    %39 = tpu.dynamic_rotate %15 by %c1_i32 dim 1 : vector<2x256xf32>, i32 -> vector<2x256xf32>
    %40 = vector.broadcast %4 : vector<1x256xf32> to vector<2x256xf32>
    %41 = arith.mulf %39, %40 : vector<2x256xf32>
    %c0_25 = arith.constant 0 : index
    %c3 = arith.constant 3 : index
    %c0_26 = arith.constant 0 : index
    %c0_27 = arith.constant 0 : index
    %42 = vector.load %arg1[%c0_25, %c3, %c0_26, %c0_27] : memref<3x9x2x2xbf16, #tpu.memory_space<vmem>>, vector<1x1x2x2xbf16>
    %43 = vector.shape_cast %42 : vector<1x1x2x2xbf16> to vector<2x2xbf16>
    %44 = arith.truncf %41 : vector<2x256xf32> to vector<2x256xbf16>
    %cst_28 = arith.constant dense<0.000000e+00> : vector<2x256xf32>
    %45 = tpu.matmul %43, %44, %cst_28 {dimension_numbers = #tpu.dot_dimension_numbers<[1], [0], [0], [1], [0, 0, 1, 1], [], []>} : vector<2x2xbf16>, vector<2x256xbf16>, vector<2x256xf32> -> vector<2x256xf32>
    %46 = arith.addf %38, %45 : vector<2x256xf32>
    %c0_29 = arith.constant 0 : index
    %c4 = arith.constant 4 : index
    %c0_30 = arith.constant 0 : index
    %c0_31 = arith.constant 0 : index
    %47 = vector.load %arg1[%c0_29, %c4, %c0_30, %c0_31] : memref<3x9x2x2xbf16, #tpu.memory_space<vmem>>, vector<1x1x2x2xbf16>
    %48 = vector.shape_cast %47 : vector<1x1x2x2xbf16> to vector<2x2xbf16>
    %49 = arith.truncf %15 : vector<2x256xf32> to vector<2x256xbf16>
    %cst_32 = arith.constant dense<0.000000e+00> : vector<2x256xf32>
    %50 = tpu.matmul %48, %49, %cst_32 {dimension_numbers = #tpu.dot_dimension_numbers<[1], [0], [0], [1], [0, 0, 1, 1], [], []>} : vector<2x2xbf16>, vector<2x256xbf16>, vector<2x256xf32> -> vector<2x256xf32>
    %51 = arith.addf %46, %50 : vector<2x256xf32>
    %c255_i32 = arith.constant 255 : i32
    %52 = tpu.dynamic_rotate %15 by %c255_i32 dim 1 : vector<2x256xf32>, i32 -> vector<2x256xf32>
    %53 = vector.broadcast %5 : vector<1x256xf32> to vector<2x256xf32>
    %54 = arith.mulf %52, %53 : vector<2x256xf32>
    %c0_33 = arith.constant 0 : index
    %c5 = arith.constant 5 : index
    %c0_34 = arith.constant 0 : index
    %c0_35 = arith.constant 0 : index
    %55 = vector.load %arg1[%c0_33, %c5, %c0_34, %c0_35] : memref<3x9x2x2xbf16, #tpu.memory_space<vmem>>, vector<1x1x2x2xbf16>
    %56 = vector.shape_cast %55 : vector<1x1x2x2xbf16> to vector<2x2xbf16>
    %57 = arith.truncf %54 : vector<2x256xf32> to vector<2x256xbf16>
    %cst_36 = arith.constant dense<0.000000e+00> : vector<2x256xf32>
    %58 = tpu.matmul %56, %57, %cst_36 {dimension_numbers = #tpu.dot_dimension_numbers<[1], [0], [0], [1], [0, 0, 1, 1], [], []>} : vector<2x2xbf16>, vector<2x256xbf16>, vector<2x256xf32> -> vector<2x256xf32>
    %59 = arith.addf %51, %58 : vector<2x256xf32>
    %c241_i32 = arith.constant 241 : i32
    %60 = tpu.dynamic_rotate %15 by %c241_i32 dim 1 : vector<2x256xf32>, i32 -> vector<2x256xf32>
    %61 = vector.broadcast %6 : vector<1x256xf32> to vector<2x256xf32>
    %62 = arith.mulf %60, %61 : vector<2x256xf32>
    %c0_37 = arith.constant 0 : index
    %c6 = arith.constant 6 : index
    %c0_38 = arith.constant 0 : index
    %c0_39 = arith.constant 0 : index
    %63 = vector.load %arg1[%c0_37, %c6, %c0_38, %c0_39] : memref<3x9x2x2xbf16, #tpu.memory_space<vmem>>, vector<1x1x2x2xbf16>
    %64 = vector.shape_cast %63 : vector<1x1x2x2xbf16> to vector<2x2xbf16>
    %65 = arith.truncf %62 : vector<2x256xf32> to vector<2x256xbf16>
    %cst_40 = arith.constant dense<0.000000e+00> : vector<2x256xf32>
    %66 = tpu.matmul %64, %65, %cst_40 {dimension_numbers = #tpu.dot_dimension_numbers<[1], [0], [0], [1], [0, 0, 1, 1], [], []>} : vector<2x2xbf16>, vector<2x256xbf16>, vector<2x256xf32> -> vector<2x256xf32>
    %67 = arith.addf %59, %66 : vector<2x256xf32>
    %c240_i32 = arith.constant 240 : i32
    %68 = tpu.dynamic_rotate %15 by %c240_i32 dim 1 : vector<2x256xf32>, i32 -> vector<2x256xf32>
    %69 = vector.broadcast %7 : vector<1x256xf32> to vector<2x256xf32>
    %70 = arith.mulf %68, %69 : vector<2x256xf32>
    %c0_41 = arith.constant 0 : index
    %c7 = arith.constant 7 : index
    %c0_42 = arith.constant 0 : index
    %c0_43 = arith.constant 0 : index
    %71 = vector.load %arg1[%c0_41, %c7, %c0_42, %c0_43] : memref<3x9x2x2xbf16, #tpu.memory_space<vmem>>, vector<1x1x2x2xbf16>
    %72 = vector.shape_cast %71 : vector<1x1x2x2xbf16> to vector<2x2xbf16>
    %73 = arith.truncf %70 : vector<2x256xf32> to vector<2x256xbf16>
    %cst_44 = arith.constant dense<0.000000e+00> : vector<2x256xf32>
    %74 = tpu.matmul %72, %73, %cst_44 {dimension_numbers = #tpu.dot_dimension_numbers<[1], [0], [0], [1], [0, 0, 1, 1], [], []>} : vector<2x2xbf16>, vector<2x256xbf16>, vector<2x256xf32> -> vector<2x256xf32>
    %75 = arith.addf %67, %74 : vector<2x256xf32>
    %c239_i32 = arith.constant 239 : i32
    %76 = tpu.dynamic_rotate %15 by %c239_i32 dim 1 : vector<2x256xf32>, i32 -> vector<2x256xf32>
    %77 = vector.broadcast %8 : vector<1x256xf32> to vector<2x256xf32>
    %78 = arith.mulf %76, %77 : vector<2x256xf32>
    %c0_45 = arith.constant 0 : index
    %c8 = arith.constant 8 : index
    %c0_46 = arith.constant 0 : index
    %c0_47 = arith.constant 0 : index
    %79 = vector.load %arg1[%c0_45, %c8, %c0_46, %c0_47] : memref<3x9x2x2xbf16, #tpu.memory_space<vmem>>, vector<1x1x2x2xbf16>
    %80 = vector.shape_cast %79 : vector<1x1x2x2xbf16> to vector<2x2xbf16>
    %81 = arith.truncf %78 : vector<2x256xf32> to vector<2x256xbf16>
    %cst_48 = arith.constant dense<0.000000e+00> : vector<2x256xf32>
    %82 = tpu.matmul %80, %81, %cst_48 {dimension_numbers = #tpu.dot_dimension_numbers<[1], [0], [0], [1], [0, 0, 1, 1], [], []>} : vector<2x2xbf16>, vector<2x256xbf16>, vector<2x256xf32> -> vector<2x256xf32>
    %83 = arith.addf %75, %82 : vector<2x256xf32>
    %c0_49 = arith.constant 0 : index
    %c0_50 = arith.constant 0 : index
    %c0_51 = arith.constant 0 : index
    %84 = vector.load %arg2[%c0_49, %c0_50, %c0_51] : memref<3x2x1xf32, #tpu.memory_space<vmem>>, vector<1x2x1xf32>
    %85 = vector.shape_cast %84 : vector<1x2x1xf32> to vector<2x1xf32>
    %86 = vector.broadcast %85 : vector<2x1xf32> to vector<2x256xf32>
    %87 = arith.addf %83, %86 : vector<2x256xf32>
    %cst_52 = arith.constant 0.000000e+00 : f32
    %88 = vector.broadcast %cst_52 : f32 to vector<2x256xf32>
    %89 = arith.maximumf %87, %88 : vector<2x256xf32>
    %c0_53 = arith.constant 0 : index
    %c1_54 = arith.constant 1 : index
    %c0_55 = arith.constant 0 : index
    %c0_56 = arith.constant 0 : index
    %90 = vector.load %arg5[%c0_53, %c1_54, %c0_55, %c0_56] : memref<1x4x2x256xf32, #tpu.memory_space<vmem>>, vector<1x1x2x256xf32>
    %91 = vector.shape_cast %90 : vector<1x1x2x256xf32> to vector<2x256xf32>
    %92 = vector.shape_cast %89 : vector<2x256xf32> to vector<1x1x2x256xf32>
    tpu.vector_store %arg5[%c0_53, %c1_54, %c0_55, %c0_56], %92 {strides = array<i32>} : memref<1x4x2x256xf32, #tpu.memory_space<vmem>>, vector<1x1x2x256xf32>,
    %c0_57 = arith.constant 0 : index
    %c2_58 = arith.constant 2 : index
    %c0_59 = arith.constant 0 : index
    %c0_60 = arith.constant 0 : index
    %93 = vector.load %arg4[%c0_57, %c2_58, %c0_59, %c0_60] : memref<1x4x2x256xf32, #tpu.memory_space<vmem>>, vector<1x1x2x256xf32>
    %94 = vector.shape_cast %93 : vector<1x1x2x256xf32> to vector<2x256xf32>
    %95 = arith.addf %94, %89 : vector<2x256xf32>
    %c17_i32_61 = arith.constant 17 : i32
    %96 = tpu.dynamic_rotate %95 by %c17_i32_61 dim 1 : vector<2x256xf32>, i32 -> vector<2x256xf32>
    %97 = vector.broadcast %1 : vector<1x256xf32> to vector<2x256xf32>
    %98 = arith.mulf %96, %97 : vector<2x256xf32>
    %c1_62 = arith.constant 1 : index
    %c0_63 = arith.constant 0 : index
    %c0_64 = arith.constant 0 : index
    %c0_65 = arith.constant 0 : index
    %99 = vector.load %arg1[%c1_62, %c0_63, %c0_64, %c0_65] : memref<3x9x2x2xbf16, #tpu.memory_space<vmem>>, vector<1x1x2x2xbf16>
    %100 = vector.shape_cast %99 : vector<1x1x2x2xbf16> to vector<2x2xbf16>
    %101 = arith.truncf %98 : vector<2x256xf32> to vector<2x256xbf16>
    %cst_66 = arith.constant dense<0.000000e+00> : vector<2x256xf32>
    %102 = tpu.matmul %100, %101, %cst_66 {dimension_numbers = #tpu.dot_dimension_numbers<[1], [0], [0], [1], [0, 0, 1, 1], [], []>} : vector<2x2xbf16>, vector<2x256xbf16>, vector<2x256xf32> -> vector<2x256xf32>
    %c16_i32_67 = arith.constant 16 : i32
    %103 = tpu.dynamic_rotate %95 by %c16_i32_67 dim 1 : vector<2x256xf32>, i32 -> vector<2x256xf32>
    %104 = vector.broadcast %2 : vector<1x256xf32> to vector<2x256xf32>
    %105 = arith.mulf %103, %104 : vector<2x256xf32>
    %c1_68 = arith.constant 1 : index
    %c1_69 = arith.constant 1 : index
    %c0_70 = arith.constant 0 : index
    %c0_71 = arith.constant 0 : index
    %106 = vector.load %arg1[%c1_68, %c1_69, %c0_70, %c0_71] : memref<3x9x2x2xbf16, #tpu.memory_space<vmem>>, vector<1x1x2x2xbf16>
    %107 = vector.shape_cast %106 : vector<1x1x2x2xbf16> to vector<2x2xbf16>
    %108 = arith.truncf %105 : vector<2x256xf32> to vector<2x256xbf16>
    %cst_72 = arith.constant dense<0.000000e+00> : vector<2x256xf32>
    %109 = tpu.matmul %107, %108, %cst_72 {dimension_numbers = #tpu.dot_dimension_numbers<[1], [0], [0], [1], [0, 0, 1, 1], [], []>} : vector<2x2xbf16>, vector<2x256xbf16>, vector<2x256xf32> -> vector<2x256xf32>
    %110 = arith.addf %102, %109 : vector<2x256xf32>
    %c15_i32_73 = arith.constant 15 : i32
    %111 = tpu.dynamic_rotate %95 by %c15_i32_73 dim 1 : vector<2x256xf32>, i32 -> vector<2x256xf32>
    %112 = vector.broadcast %3 : vector<1x256xf32> to vector<2x256xf32>
    %113 = arith.mulf %111, %112 : vector<2x256xf32>
    %c1_74 = arith.constant 1 : index
    %c2_75 = arith.constant 2 : index
    %c0_76 = arith.constant 0 : index
    %c0_77 = arith.constant 0 : index
    %114 = vector.load %arg1[%c1_74, %c2_75, %c0_76, %c0_77] : memref<3x9x2x2xbf16, #tpu.memory_space<vmem>>, vector<1x1x2x2xbf16>
    %115 = vector.shape_cast %114 : vector<1x1x2x2xbf16> to vector<2x2xbf16>
    %116 = arith.truncf %113 : vector<2x256xf32> to vector<2x256xbf16>
    %cst_78 = arith.constant dense<0.000000e+00> : vector<2x256xf32>
    %117 = tpu.matmul %115, %116, %cst_78 {dimension_numbers = #tpu.dot_dimension_numbers<[1], [0], [0], [1], [0, 0, 1, 1], [], []>} : vector<2x2xbf16>, vector<2x256xbf16>, vector<2x256xf32> -> vector<2x256xf32>
    %118 = arith.addf %110, %117 : vector<2x256xf32>
    %c1_i32_79 = arith.constant 1 : i32
    %119 = tpu.dynamic_rotate %95 by %c1_i32_79 dim 1 : vector<2x256xf32>, i32 -> vector<2x256xf32>
    %120 = vector.broadcast %4 : vector<1x256xf32> to vector<2x256xf32>
    %121 = arith.mulf %119, %120 : vector<2x256xf32>
    %c1_80 = arith.constant 1 : index
    %c3_81 = arith.constant 3 : index
    %c0_82 = arith.constant 0 : index
    %c0_83 = arith.constant 0 : index
    %122 = vector.load %arg1[%c1_80, %c3_81, %c0_82, %c0_83] : memref<3x9x2x2xbf16, #tpu.memory_space<vmem>>, vector<1x1x2x2xbf16>
    %123 = vector.shape_cast %122 : vector<1x1x2x2xbf16> to vector<2x2xbf16>
    %124 = arith.truncf %121 : vector<2x256xf32> to vector<2x256xbf16>
    %cst_84 = arith.constant dense<0.000000e+00> : vector<2x256xf32>
    %125 = tpu.matmul %123, %124, %cst_84 {dimension_numbers = #tpu.dot_dimension_numbers<[1], [0], [0], [1], [0, 0, 1, 1], [], []>} : vector<2x2xbf16>, vector<2x256xbf16>, vector<2x256xf32> -> vector<2x256xf32>
    %126 = arith.addf %118, %125 : vector<2x256xf32>
    %c1_85 = arith.constant 1 : index
    %c4_86 = arith.constant 4 : index
    %c0_87 = arith.constant 0 : index
    %c0_88 = arith.constant 0 : index
    %127 = vector.load %arg1[%c1_85, %c4_86, %c0_87, %c0_88] : memref<3x9x2x2xbf16, #tpu.memory_space<vmem>>, vector<1x1x2x2xbf16>
    %128 = vector.shape_cast %127 : vector<1x1x2x2xbf16> to vector<2x2xbf16>
    %129 = arith.truncf %95 : vector<2x256xf32> to vector<2x256xbf16>
    %cst_89 = arith.constant dense<0.000000e+00> : vector<2x256xf32>
    %130 = tpu.matmul %128, %129, %cst_89 {dimension_numbers = #tpu.dot_dimension_numbers<[1], [0], [0], [1], [0, 0, 1, 1], [], []>} : vector<2x2xbf16>, vector<2x256xbf16>, vector<2x256xf32> -> vector<2x256xf32>
    %131 = arith.addf %126, %130 : vector<2x256xf32>
    %c255_i32_90 = arith.constant 255 : i32
    %132 = tpu.dynamic_rotate %95 by %c255_i32_90 dim 1 : vector<2x256xf32>, i32 -> vector<2x256xf32>
    %133 = vector.broadcast %5 : vector<1x256xf32> to vector<2x256xf32>
    %134 = arith.mulf %132, %133 : vector<2x256xf32>
    %c1_91 = arith.constant 1 : index
    %c5_92 = arith.constant 5 : index
    %c0_93 = arith.constant 0 : index
    %c0_94 = arith.constant 0 : index
    %135 = vector.load %arg1[%c1_91, %c5_92, %c0_93, %c0_94] : memref<3x9x2x2xbf16, #tpu.memory_space<vmem>>, vector<1x1x2x2xbf16>
    %136 = vector.shape_cast %135 : vector<1x1x2x2xbf16> to vector<2x2xbf16>
    %137 = arith.truncf %134 : vector<2x256xf32> to vector<2x256xbf16>
    %cst_95 = arith.constant dense<0.000000e+00> : vector<2x256xf32>
    %138 = tpu.matmul %136, %137, %cst_95 {dimension_numbers = #tpu.dot_dimension_numbers<[1], [0], [0], [1], [0, 0, 1, 1], [], []>} : vector<2x2xbf16>, vector<2x256xbf16>, vector<2x256xf32> -> vector<2x256xf32>
    %139 = arith.addf %131, %138 : vector<2x256xf32>
    %c241_i32_96 = arith.constant 241 : i32
    %140 = tpu.dynamic_rotate %95 by %c241_i32_96 dim 1 : vector<2x256xf32>, i32 -> vector<2x256xf32>
    %141 = vector.broadcast %6 : vector<1x256xf32> to vector<2x256xf32>
    %142 = arith.mulf %140, %141 : vector<2x256xf32>
    %c1_97 = arith.constant 1 : index
    %c6_98 = arith.constant 6 : index
    %c0_99 = arith.constant 0 : index
    %c0_100 = arith.constant 0 : index
    %143 = vector.load %arg1[%c1_97, %c6_98, %c0_99, %c0_100] : memref<3x9x2x2xbf16, #tpu.memory_space<vmem>>, vector<1x1x2x2xbf16>
    %144 = vector.shape_cast %143 : vector<1x1x2x2xbf16> to vector<2x2xbf16>
    %145 = arith.truncf %142 : vector<2x256xf32> to vector<2x256xbf16>
    %cst_101 = arith.constant dense<0.000000e+00> : vector<2x256xf32>
    %146 = tpu.matmul %144, %145, %cst_101 {dimension_numbers = #tpu.dot_dimension_numbers<[1], [0], [0], [1], [0, 0, 1, 1], [], []>} : vector<2x2xbf16>, vector<2x256xbf16>, vector<2x256xf32> -> vector<2x256xf32>
    %147 = arith.addf %139, %146 : vector<2x256xf32>
    %c240_i32_102 = arith.constant 240 : i32
    %148 = tpu.dynamic_rotate %95 by %c240_i32_102 dim 1 : vector<2x256xf32>, i32 -> vector<2x256xf32>
    %149 = vector.broadcast %7 : vector<1x256xf32> to vector<2x256xf32>
    %150 = arith.mulf %148, %149 : vector<2x256xf32>
    %c1_103 = arith.constant 1 : index
    %c7_104 = arith.constant 7 : index
    %c0_105 = arith.constant 0 : index
    %c0_106 = arith.constant 0 : index
    %151 = vector.load %arg1[%c1_103, %c7_104, %c0_105, %c0_106] : memref<3x9x2x2xbf16, #tpu.memory_space<vmem>>, vector<1x1x2x2xbf16>
    %152 = vector.shape_cast %151 : vector<1x1x2x2xbf16> to vector<2x2xbf16>
    %153 = arith.truncf %150 : vector<2x256xf32> to vector<2x256xbf16>
    %cst_107 = arith.constant dense<0.000000e+00> : vector<2x256xf32>
    %154 = tpu.matmul %152, %153, %cst_107 {dimension_numbers = #tpu.dot_dimension_numbers<[1], [0], [0], [1], [0, 0, 1, 1], [], []>} : vector<2x2xbf16>, vector<2x256xbf16>, vector<2x256xf32> -> vector<2x256xf32>
    %155 = arith.addf %147, %154 : vector<2x256xf32>
    %c239_i32_108 = arith.constant 239 : i32
    %156 = tpu.dynamic_rotate %95 by %c239_i32_108 dim 1 : vector<2x256xf32>, i32 -> vector<2x256xf32>
    %157 = vector.broadcast %8 : vector<1x256xf32> to vector<2x256xf32>
    %158 = arith.mulf %156, %157 : vector<2x256xf32>
    %c1_109 = arith.constant 1 : index
    %c8_110 = arith.constant 8 : index
    %c0_111 = arith.constant 0 : index
    %c0_112 = arith.constant 0 : index
    %159 = vector.load %arg1[%c1_109, %c8_110, %c0_111, %c0_112] : memref<3x9x2x2xbf16, #tpu.memory_space<vmem>>, vector<1x1x2x2xbf16>
    %160 = vector.shape_cast %159 : vector<1x1x2x2xbf16> to vector<2x2xbf16>
    %161 = arith.truncf %158 : vector<2x256xf32> to vector<2x256xbf16>
    %cst_113 = arith.constant dense<0.000000e+00> : vector<2x256xf32>
    %162 = tpu.matmul %160, %161, %cst_113 {dimension_numbers = #tpu.dot_dimension_numbers<[1], [0], [0], [1], [0, 0, 1, 1], [], []>} : vector<2x2xbf16>, vector<2x256xbf16>, vector<2x256xf32> -> vector<2x256xf32>
    %163 = arith.addf %155, %162 : vector<2x256xf32>
    %c1_114 = arith.constant 1 : index
    %c0_115 = arith.constant 0 : index
    %c0_116 = arith.constant 0 : index
    %164 = vector.load %arg2[%c1_114, %c0_115, %c0_116] : memref<3x2x1xf32, #tpu.memory_space<vmem>>, vector<1x2x1xf32>
    %165 = vector.shape_cast %164 : vector<1x2x1xf32> to vector<2x1xf32>
    %166 = vector.broadcast %165 : vector<2x1xf32> to vector<2x256xf32>
    %167 = arith.addf %163, %166 : vector<2x256xf32>
    %cst_117 = arith.constant 0.000000e+00 : f32
    %168 = vector.broadcast %cst_117 : f32 to vector<2x256xf32>
    %169 = arith.maximumf %167, %168 : vector<2x256xf32>
    %c0_118 = arith.constant 0 : index
    %c2_119 = arith.constant 2 : index
    %c0_120 = arith.constant 0 : index
    %c0_121 = arith.constant 0 : index
    %170 = vector.load %arg5[%c0_118, %c2_119, %c0_120, %c0_121] : memref<1x4x2x256xf32, #tpu.memory_space<vmem>>, vector<1x1x2x256xf32>
    %171 = vector.shape_cast %170 : vector<1x1x2x256xf32> to vector<2x256xf32>
    %172 = vector.shape_cast %169 : vector<2x256xf32> to vector<1x1x2x256xf32>
    tpu.vector_store %arg5[%c0_118, %c2_119, %c0_120, %c0_121], %172 {strides = array<i32>} : memref<1x4x2x256xf32, #tpu.memory_space<vmem>>, vector<1x1x2x256xf32>,
    %c0_122 = arith.constant 0 : index
    %c3_123 = arith.constant 3 : index
    %c0_124 = arith.constant 0 : index
    %c0_125 = arith.constant 0 : index
    %173 = vector.load %arg4[%c0_122, %c3_123, %c0_124, %c0_125] : memref<1x4x2x256xf32, #tpu.memory_space<vmem>>, vector<1x1x2x256xf32>
    %174 = vector.shape_cast %173 : vector<1x1x2x256xf32> to vector<2x256xf32>
    %175 = arith.addf %174, %169 : vector<2x256xf32>
    %c17_i32_126 = arith.constant 17 : i32
    %176 = tpu.dynamic_rotate %175 by %c17_i32_126 dim 1 : vector<2x256xf32>, i32 -> vector<2x256xf32>
    %177 = vector.broadcast %1 : vector<1x256xf32> to vector<2x256xf32>
    %178 = arith.mulf %176, %177 : vector<2x256xf32>
    %c2_127 = arith.constant 2 : index
    %c0_128 = arith.constant 0 : index
    %c0_129 = arith.constant 0 : index
    %c0_130 = arith.constant 0 : index
    %179 = vector.load %arg1[%c2_127, %c0_128, %c0_129, %c0_130] : memref<3x9x2x2xbf16, #tpu.memory_space<vmem>>, vector<1x1x2x2xbf16>
    %180 = vector.shape_cast %179 : vector<1x1x2x2xbf16> to vector<2x2xbf16>
    %181 = arith.truncf %178 : vector<2x256xf32> to vector<2x256xbf16>
    %cst_131 = arith.constant dense<0.000000e+00> : vector<2x256xf32>
    %182 = tpu.matmul %180, %181, %cst_131 {dimension_numbers = #tpu.dot_dimension_numbers<[1], [0], [0], [1], [0, 0, 1, 1], [], []>} : vector<2x2xbf16>, vector<2x256xbf16>, vector<2x256xf32> -> vector<2x256xf32>
    %c16_i32_132 = arith.constant 16 : i32
    %183 = tpu.dynamic_rotate %175 by %c16_i32_132 dim 1 : vector<2x256xf32>, i32 -> vector<2x256xf32>
    %184 = vector.broadcast %2 : vector<1x256xf32> to vector<2x256xf32>
    %185 = arith.mulf %183, %184 : vector<2x256xf32>
    %c2_133 = arith.constant 2 : index
    %c1_134 = arith.constant 1 : index
    %c0_135 = arith.constant 0 : index
    %c0_136 = arith.constant 0 : index
    %186 = vector.load %arg1[%c2_133, %c1_134, %c0_135, %c0_136] : memref<3x9x2x2xbf16, #tpu.memory_space<vmem>>, vector<1x1x2x2xbf16>
    %187 = vector.shape_cast %186 : vector<1x1x2x2xbf16> to vector<2x2xbf16>
    %188 = arith.truncf %185 : vector<2x256xf32> to vector<2x256xbf16>
    %cst_137 = arith.constant dense<0.000000e+00> : vector<2x256xf32>
    %189 = tpu.matmul %187, %188, %cst_137 {dimension_numbers = #tpu.dot_dimension_numbers<[1], [0], [0], [1], [0, 0, 1, 1], [], []>} : vector<2x2xbf16>, vector<2x256xbf16>, vector<2x256xf32> -> vector<2x256xf32>
    %190 = arith.addf %182, %189 : vector<2x256xf32>
    %c15_i32_138 = arith.constant 15 : i32
    %191 = tpu.dynamic_rotate %175 by %c15_i32_138 dim 1 : vector<2x256xf32>, i32 -> vector<2x256xf32>
    %192 = vector.broadcast %3 : vector<1x256xf32> to vector<2x256xf32>
    %193 = arith.mulf %191, %192 : vector<2x256xf32>
    %c2_139 = arith.constant 2 : index
    %c2_140 = arith.constant 2 : index
    %c0_141 = arith.constant 0 : index
    %c0_142 = arith.constant 0 : index
    %194 = vector.load %arg1[%c2_139, %c2_140, %c0_141, %c0_142] : memref<3x9x2x2xbf16, #tpu.memory_space<vmem>>, vector<1x1x2x2xbf16>
    %195 = vector.shape_cast %194 : vector<1x1x2x2xbf16> to vector<2x2xbf16>
    %196 = arith.truncf %193 : vector<2x256xf32> to vector<2x256xbf16>
    %cst_143 = arith.constant dense<0.000000e+00> : vector<2x256xf32>
    %197 = tpu.matmul %195, %196, %cst_143 {dimension_numbers = #tpu.dot_dimension_numbers<[1], [0], [0], [1], [0, 0, 1, 1], [], []>} : vector<2x2xbf16>, vector<2x256xbf16>, vector<2x256xf32> -> vector<2x256xf32>
    %198 = arith.addf %190, %197 : vector<2x256xf32>
    %c1_i32_144 = arith.constant 1 : i32
    %199 = tpu.dynamic_rotate %175 by %c1_i32_144 dim 1 : vector<2x256xf32>, i32 -> vector<2x256xf32>
    %200 = vector.broadcast %4 : vector<1x256xf32> to vector<2x256xf32>
    %201 = arith.mulf %199, %200 : vector<2x256xf32>
    %c2_145 = arith.constant 2 : index
    %c3_146 = arith.constant 3 : index
    %c0_147 = arith.constant 0 : index
    %c0_148 = arith.constant 0 : index
    %202 = vector.load %arg1[%c2_145, %c3_146, %c0_147, %c0_148] : memref<3x9x2x2xbf16, #tpu.memory_space<vmem>>, vector<1x1x2x2xbf16>
    %203 = vector.shape_cast %202 : vector<1x1x2x2xbf16> to vector<2x2xbf16>
    %204 = arith.truncf %201 : vector<2x256xf32> to vector<2x256xbf16>
    %cst_149 = arith.constant dense<0.000000e+00> : vector<2x256xf32>
    %205 = tpu.matmul %203, %204, %cst_149 {dimension_numbers = #tpu.dot_dimension_numbers<[1], [0], [0], [1], [0, 0, 1, 1], [], []>} : vector<2x2xbf16>, vector<2x256xbf16>, vector<2x256xf32> -> vector<2x256xf32>
    %206 = arith.addf %198, %205 : vector<2x256xf32>
    %c2_150 = arith.constant 2 : index
    %c4_151 = arith.constant 4 : index
    %c0_152 = arith.constant 0 : index
    %c0_153 = arith.constant 0 : index
    %207 = vector.load %arg1[%c2_150, %c4_151, %c0_152, %c0_153] : memref<3x9x2x2xbf16, #tpu.memory_space<vmem>>, vector<1x1x2x2xbf16>
    %208 = vector.shape_cast %207 : vector<1x1x2x2xbf16> to vector<2x2xbf16>
    %209 = arith.truncf %175 : vector<2x256xf32> to vector<2x256xbf16>
    %cst_154 = arith.constant dense<0.000000e+00> : vector<2x256xf32>
    %210 = tpu.matmul %208, %209, %cst_154 {dimension_numbers = #tpu.dot_dimension_numbers<[1], [0], [0], [1], [0, 0, 1, 1], [], []>} : vector<2x2xbf16>, vector<2x256xbf16>, vector<2x256xf32> -> vector<2x256xf32>
    %211 = arith.addf %206, %210 : vector<2x256xf32>
    %c255_i32_155 = arith.constant 255 : i32
    %212 = tpu.dynamic_rotate %175 by %c255_i32_155 dim 1 : vector<2x256xf32>, i32 -> vector<2x256xf32>
    %213 = vector.broadcast %5 : vector<1x256xf32> to vector<2x256xf32>
    %214 = arith.mulf %212, %213 : vector<2x256xf32>
    %c2_156 = arith.constant 2 : index
    %c5_157 = arith.constant 5 : index
    %c0_158 = arith.constant 0 : index
    %c0_159 = arith.constant 0 : index
    %215 = vector.load %arg1[%c2_156, %c5_157, %c0_158, %c0_159] : memref<3x9x2x2xbf16, #tpu.memory_space<vmem>>, vector<1x1x2x2xbf16>
    %216 = vector.shape_cast %215 : vector<1x1x2x2xbf16> to vector<2x2xbf16>
    %217 = arith.truncf %214 : vector<2x256xf32> to vector<2x256xbf16>
    %cst_160 = arith.constant dense<0.000000e+00> : vector<2x256xf32>
    %218 = tpu.matmul %216, %217, %cst_160 {dimension_numbers = #tpu.dot_dimension_numbers<[1], [0], [0], [1], [0, 0, 1, 1], [], []>} : vector<2x2xbf16>, vector<2x256xbf16>, vector<2x256xf32> -> vector<2x256xf32>
    %219 = arith.addf %211, %218 : vector<2x256xf32>
    %c241_i32_161 = arith.constant 241 : i32
    %220 = tpu.dynamic_rotate %175 by %c241_i32_161 dim 1 : vector<2x256xf32>, i32 -> vector<2x256xf32>
    %221 = vector.broadcast %6 : vector<1x256xf32> to vector<2x256xf32>
    %222 = arith.mulf %220, %221 : vector<2x256xf32>
    %c2_162 = arith.constant 2 : index
    %c6_163 = arith.constant 6 : index
    %c0_164 = arith.constant 0 : index
    %c0_165 = arith.constant 0 : index
    %223 = vector.load %arg1[%c2_162, %c6_163, %c0_164, %c0_165] : memref<3x9x2x2xbf16, #tpu.memory_space<vmem>>, vector<1x1x2x2xbf16>
    %224 = vector.shape_cast %223 : vector<1x1x2x2xbf16> to vector<2x2xbf16>
    %225 = arith.truncf %222 : vector<2x256xf32> to vector<2x256xbf16>
    %cst_166 = arith.constant dense<0.000000e+00> : vector<2x256xf32>
    %226 = tpu.matmul %224, %225, %cst_166 {dimension_numbers = #tpu.dot_dimension_numbers<[1], [0], [0], [1], [0, 0, 1, 1], [], []>} : vector<2x2xbf16>, vector<2x256xbf16>, vector<2x256xf32> -> vector<2x256xf32>
    %227 = arith.addf %219, %226 : vector<2x256xf32>
    %c240_i32_167 = arith.constant 240 : i32
    %228 = tpu.dynamic_rotate %175 by %c240_i32_167 dim 1 : vector<2x256xf32>, i32 -> vector<2x256xf32>
    %229 = vector.broadcast %7 : vector<1x256xf32> to vector<2x256xf32>
    %230 = arith.mulf %228, %229 : vector<2x256xf32>
    %c2_168 = arith.constant 2 : index
    %c7_169 = arith.constant 7 : index
    %c0_170 = arith.constant 0 : index
    %c0_171 = arith.constant 0 : index
    %231 = vector.load %arg1[%c2_168, %c7_169, %c0_170, %c0_171] : memref<3x9x2x2xbf16, #tpu.memory_space<vmem>>, vector<1x1x2x2xbf16>
    %232 = vector.shape_cast %231 : vector<1x1x2x2xbf16> to vector<2x2xbf16>
    %233 = arith.truncf %230 : vector<2x256xf32> to vector<2x256xbf16>
    %cst_172 = arith.constant dense<0.000000e+00> : vector<2x256xf32>
    %234 = tpu.matmul %232, %233, %cst_172 {dimension_numbers = #tpu.dot_dimension_numbers<[1], [0], [0], [1], [0, 0, 1, 1], [], []>} : vector<2x2xbf16>, vector<2x256xbf16>, vector<2x256xf32> -> vector<2x256xf32>
    %235 = arith.addf %227, %234 : vector<2x256xf32>
    %c239_i32_173 = arith.constant 239 : i32
    %236 = tpu.dynamic_rotate %175 by %c239_i32_173 dim 1 : vector<2x256xf32>, i32 -> vector<2x256xf32>
    %237 = vector.broadcast %8 : vector<1x256xf32> to vector<2x256xf32>
    %238 = arith.mulf %236, %237 : vector<2x256xf32>
    %c2_174 = arith.constant 2 : index
    %c8_175 = arith.constant 8 : index
    %c0_176 = arith.constant 0 : index
    %c0_177 = arith.constant 0 : index
    %239 = vector.load %arg1[%c2_174, %c8_175, %c0_176, %c0_177] : memref<3x9x2x2xbf16, #tpu.memory_space<vmem>>, vector<1x1x2x2xbf16>
    %240 = vector.shape_cast %239 : vector<1x1x2x2xbf16> to vector<2x2xbf16>
    %241 = arith.truncf %238 : vector<2x256xf32> to vector<2x256xbf16>
    %cst_178 = arith.constant dense<0.000000e+00> : vector<2x256xf32>
    %242 = tpu.matmul %240, %241, %cst_178 {dimension_numbers = #tpu.dot_dimension_numbers<[1], [0], [0], [1], [0, 0, 1, 1], [], []>} : vector<2x2xbf16>, vector<2x256xbf16>, vector<2x256xf32> -> vector<2x256xf32>
    %243 = arith.addf %235, %242 : vector<2x256xf32>
    %c2_179 = arith.constant 2 : index
    %c0_180 = arith.constant 0 : index
    %c0_181 = arith.constant 0 : index
    %244 = vector.load %arg2[%c2_179, %c0_180, %c0_181] : memref<3x2x1xf32, #tpu.memory_space<vmem>>, vector<1x2x1xf32>
    %245 = vector.shape_cast %244 : vector<1x2x1xf32> to vector<2x1xf32>
    %246 = vector.broadcast %245 : vector<2x1xf32> to vector<2x256xf32>
    %247 = arith.addf %243, %246 : vector<2x256xf32>
    %cst_182 = arith.constant 0.000000e+00 : f32
    %248 = vector.broadcast %cst_182 : f32 to vector<2x256xf32>
    %249 = arith.maximumf %247, %248 : vector<2x256xf32>
    %c0_183 = arith.constant 0 : index
    %c3_184 = arith.constant 3 : index
    %c0_185 = arith.constant 0 : index
    %c0_186 = arith.constant 0 : index
    %250 = vector.load %arg5[%c0_183, %c3_184, %c0_185, %c0_186] : memref<1x4x2x256xf32, #tpu.memory_space<vmem>>, vector<1x1x2x256xf32>
    %251 = vector.shape_cast %250 : vector<1x1x2x256xf32> to vector<2x256xf32>
    %252 = vector.shape_cast %249 : vector<2x256xf32> to vector<1x1x2x256xf32>
    tpu.vector_store %arg5[%c0_183, %c3_184, %c0_185, %c0_186], %252 {strides = array<i32>} : memref<1x4x2x256xf32, #tpu.memory_space<vmem>>, vector<1x1x2x256xf32>,
    return
  }
  func.func @transform_0(%arg0: i32) -> (i32, i32, i32, i32) {
    %c0_i32 = arith.constant 0 : i32
    %c0_i32_0 = arith.constant 0 : i32
    %c0_i32_1 = arith.constant 0 : i32
    %c0_i32_2 = arith.constant 0 : i32
    %c0_i32_3 = arith.constant 0 : i32
    return %c0_i32, %c0_i32_0, %c0_i32_1, %c0_i32_2 : i32, i32, i32, i32
  }
  func.func @transform_1(%arg0: i32) -> (i32, i32, i32) {
    %c0_i32 = arith.constant 0 : i32
    %c0_i32_0 = arith.constant 0 : i32
    %c0_i32_1 = arith.constant 0 : i32
    %c0_i32_2 = arith.constant 0 : i32
    return %c0_i32, %c0_i32_0, %c0_i32_1 : i32, i32, i32
  }
  func.func @transform_2(%arg0: i32) -> (i32, i32) {
    %c0_i32 = arith.constant 0 : i32
    %c0_i32_0 = arith.constant 0 : i32
    %c0_i32_1 = arith.constant 0 : i32
    return %c0_i32, %c0_i32_0 : i32, i32
  }
  func.func @transform_3(%arg0: i32) -> (i32, i32, i32, i32) {
    %c0_i32 = arith.constant 0 : i32
    %c0_i32_0 = arith.constant 0 : i32
    %c0_i32_1 = arith.constant 0 : i32
    %c0_i32_2 = arith.constant 0 : i32
    return %arg0, %c0_i32, %c0_i32_0, %c0_i32_1 : i32, i32, i32, i32
  }
  func.func @transform_4(%arg0: i32) -> (i32, i32, i32, i32) {
    %c0_i32 = arith.constant 0 : i32
    %c0_i32_0 = arith.constant 0 : i32
    %c0_i32_1 = arith.constant 0 : i32
    %c0_i32_2 = arith.constant 0 : i32
    return %arg0, %c0_i32, %c0_i32_0, %c0_i32_1 : i32, i32, i32, i32
  }
}

</mosaic_0001>

<bundles_post_ra>
// kernel: res2net_block.1
= control target key start
LH: loop header
LB: loop body
LE: loop exit
PB: predicated region body
PF: predicated region fallthrough
CT: control target
= control target key end

     0   :  { %s2309_s15 = smov 0   ;;  %s2903_s0 = inlined_call_operand.vmem [shape: bf16[3,9,2,2], index: 0, kind: input, shape index: {}]   ;;  %s2904_s1 = inlined_call_operand.vmem [shape: f32[3,2,1], index: 1, kind: input, shape index: {}]   ;;  %s2905_s2 = inlined_call_operand.vmem [shape: f32[9,256], index: 2, kind: input, shape index: {}]   ;;  %s2906_s3 = inlined_call_operand.vmem [shape: f32[2,4,2,256], index: 3, kind: input, shape index: {}]   ;;  %s2907_s4 = inlined_call_operand.vmem [shape: f32[2,4,2,256], index: 4, kind: output, shape index: {}]  }
   0x1 LB: > { %s2139_s16 = sadd.s32 4294967295, %s2272_s15   ;;  %p2143_p0 = scmp.ge.s32.totalorder %s2272_s15, 1  ;;  %s2272_s15 = sphi %s2309_s15, %s14_s15  }
   0x2   : > { %p162_p1 = scmp.lt.s32.totalorder %s2272_s15, 3 }
   0x4   : > { %p163_p2 = pnand %p2143_p0, %p162_p1 }
   0x5   : > { %p188_p3 = scmp.lt.s32.totalorder (!%p163_p2), %s2139_s16, 1  ;;  %v2274_v1 = vmov (!%p163_p2), 0   ;;  %s2275_s21 = smov (!%p163_p2), 17   ;;  %v857_v3 = vld [vmem:[%s2904_s1] sm:$0x3] (!%p163_p2)  ;;  %v222_v4 = vlaneseq (!%p163_p2)  ;;  %v2387_v10 = vld [vmem:[%s2905_s2 + $0x8] sm:$0xff] (!%p163_p2) }
   0x6   : > { %166 = sbr.rel (%p163_p2) target bundleno = 1171 (0x493), region = 36  ;;  %304 = vmatprep.mubr.bf16.mxu0 (!%p163_p2), %v2274_v1  ;;  %s2276_s22 = smov (!%p163_p2), 16   ;;  %354 = vmatprep.mubr.bf16.mxu1 (!%p163_p2), %v2274_v1  ;;  %v2382_v9 = vld [vmem:[%s2905_s2] sm:$0xff] (!%p163_p2)  ;;  %vm265_vm3 = vcmask (!%p163_p2), 1040384   ;;  %vm261_vm5 = vcmask (!%p163_p2), 15360  }
   0x7   : > { %2264 = vset.pattern.permute.xlu0 (!%p163_p2), %v2274_v1  ;;  %2265 = vset.pattern.permute.xlu1 (!%p163_p2), %v2274_v1  ;;  %s2277_s23 = smov (!%p163_p2), 15   ;;  %s2278_s24 = smov (!%p163_p2), 1   ;;  %v2373_v5 = vshrl.u32 (!%p163_p2), %v222_v4, 7  ;;  %v2375_v6 = vand.u32 (!%p163_p2), 127, %v222_v4  ;;  %v237_v46 = vld [vmem:[%s2903_s0] sm:$0x1] (!%p163_p2) }
   0x8   : > { %s2279_s25 = smov (!%p163_p2), 127   ;;  %s2280_s26 = smov (!%p163_p2), 113   ;;  %v2150_v47 = vld [vmem:[%s2903_s0 + $0x1] sm:$0x1] (!%p163_p2) }
   0x9   : > { %s2281_s27 = smov (!%p163_p2), 112   ;;  %s2282_s28 = smov (!%p163_p2), 111   ;;  %v229_v7 = vsub.s32 (!%p163_p2), 0, %v2373_v5  ;;  %v249_v8 = vsub.s32 (!%p163_p2), 1, %v2373_v5  ;;  %v372_v13 = vsub.s32 (!%p163_p2), 2, %v2373_v5  ;;  %vm224_vm0 = vcmp.lt.s32.totalorder (!%p163_p2), %v2375_v6, 17 }
   0xa   : > { %vm244_vm1 = vcmp.lt.s32.totalorder (!%p163_p2), %v2375_v6, 16  ;;  %vm367_vm2 = vcmp.lt.s32.totalorder (!%p163_p2), %v2375_v6, 15  ;;  %v445_v22 = vsub.s32 (!%p163_p2), 3, %v2373_v5  ;;  %vm440_vm4 = vcmp.lt.s32.totalorder (!%p163_p2), %v2375_v6, 1 }
   0xb   : > { %v2393_v14 = vrot.slane (!%p163_p2), %v2382_v9, %v229_v7  ;;  %v2396_v15 = vrot.slane (!%p163_p2), %v2382_v9, %v249_v8  ;;  %v2399_v16 = vrot.slane (!%p163_p2), %v2387_v10, %v229_v7  ;;  %v2402_v17 = vrot.slane (!%p163_p2), %v2387_v10, %v249_v8 }
   0xc   : > { %v2406_v20 = vrot.slane (!%p163_p2), %v2382_v9, %v372_v13  ;;  %v2409_v21 = vrot.slane (!%p163_p2), %v2387_v10, %v372_v13  ;;  %v574_v31 = vsub.s32 (!%p163_p2), 5, %v2373_v5  ;;  %v2431_v40 = vrot.slane (!%p163_p2), %v2382_v9, %v445_v22 }
   0xd   : > { %s2909_s16 = smov (!%p188_p3, %s2139_s16), 1  ;;  %v2434_v41 = vrot.slane %v2387_v10, %v445_v22  ;;  %vm569_vm6 = vcmp.lt.s32.totalorder %v2375_v6, 127  ;;  %v647_v55 = vsub.s32 6, %v2373_v5  ;;  %vm642_vm7 = vcmp.lt.s32.totalorder %v2375_v6, 113  ;;  %v2158_v22 = vld [vmem:[%s2903_s0 + $0x3] sm:$0x1] }
   0xe   : > { %s2241_s17 = sshll.u32 %s2909_s16, 4  ;;  %v2450_v52 = vrot.slane %v2382_v9, %v574_v31  ;;  %v2465_v60 = vrot.slane %v2387_v10, %v574_v31  ;;  %vm715_vm8 = vcmp.lt.s32.totalorder %v2375_v6, 112  ;;  %vm788_vm9 = vcmp.lt.s32.totalorder %v2375_v6, 111 }
   0xf   : > { %s2325_s20 = scalar_lea.vmem %s2906_s3, %s2241_s17  ;;  %v2478_v8 = vrot.slane %v2382_v9, %v647_v55  ;;  %s2574_s5 = scalar_lea.vmem %s2907_s4, %s2241_s17 }
  0x10   : > { %v2328_v0 = vld.sshfl [vmem:[%s2325_s20 + $0x4] sm:$0x33 pattern:$0x76325410] }
  0x11   : > { %218 = vrot.lane.b32.xlu1 %v2328_v0, %s2275_s21  ;;  %240 = vrot.lane.b32.xlu0 %v2328_v0, %s2276_s22  ;;  %v2337_v2 = vcombine.high %v2328_v0, %v2328_v0 }
  0x13   : > { %v512_v56 = vpack.c.bf16 %v2337_v2, %v2337_v2 }
  0x15   : > { %220 = vrot.lane.b32.xlu1 %v2337_v2, %s2275_s21  ;;  %242 = vrot.lane.b32.xlu0 %v2337_v2, %s2276_s22 }
  0x19   : > { %365 = vrot.lane.b32.xlu1 %v2337_v2, %s2277_s23  ;;  %363 = vrot.lane.b32.xlu0 %v2328_v0, %s2277_s23 }
  0x1d   : > { %438 = vrot.lane.b32.xlu1 %v2337_v2, %s2278_s24  ;;  %436 = vrot.lane.b32.xlu0 %v2328_v0, %s2278_s24 }
  0x21   : > { %567 = vrot.lane.b32.xlu1 %v2337_v2, %s2279_s25  ;;  %565 = vrot.lane.b32.xlu0 %v2328_v0, %s2279_s25 }
  0x25   : > { %640 = vrot.lane.b32.xlu1 %v2337_v2, %s2280_s26  ;;  %638 = vrot.lane.b32.xlu0 %v2328_v0, %s2280_s26 }
  0x29   : > { %713 = vrot.lane.b32.xlu1 %v2337_v2, %s2281_s27  ;;  %711 = vrot.lane.b32.xlu0 %v2328_v0, %s2281_s27 }
  0x2d   : > { %786 = vrot.lane.b32.xlu1 %v2337_v2, %s2282_s28  ;;  %784 = vrot.lane.b32.xlu0 %v2328_v0, %s2282_s28 }
  0x31   : > { %860 = vperm.xlu0 %2264, %v857_v3   ;;  %v511_v3 = vpack.c.bf16 %v2328_v0, %v2328_v0 }
  0x83   : > { %v219_v11 = vpop.permute.xlu1 %218  ;;  %v241_v12 = vpop.permute.xlu0 %240 }
  0x87   : > { %v221_v18 = vpop.permute.xlu1 %220  ;;  %v243_v19 = vpop.permute.xlu0 %242 }
  0x88   : > { %v225_v23 = vsel %vm224_vm0, %v219_v11, %v221_v18  ;;  %v226_v24 = vsel %vm224_vm0, %v221_v18, %v219_v11  ;;  %v245_v25 = vsel %vm244_vm1, %v241_v12, %v243_v19  ;;  %v246_v26 = vsel %vm244_vm1, %v243_v19, %v241_v12  ;;  %v2155_v19 = vld [vmem:[%s2903_s0 + $0x2] sm:$0x1] }
  0x89   : > { %v235_v27 = vmul.f32 %v2393_v14, %v226_v24  ;;  %v255_v28 = vmul.f32 %v2396_v15, %v246_v26  ;;  %v236_v29 = vmul.f32 %v2399_v16, %v225_v23  ;;  %v256_v30 = vmul.f32 %v2402_v17, %v245_v25 }
  0x8a   : > { %v720_v11 = vsub.s32 7, %v2373_v5  ;;  %v2487_v18 = vrot.slane %v2387_v10, %v647_v55 }
  0x8b   : > { %v239_v32 = vpack.c.bf16 %v236_v29, %v236_v29  ;;  %v366_v33 = vpop.permute.xlu1 %365  ;;  %v260_v34 = vpack.c.bf16 %v256_v30, %v256_v30  ;;  %v364_v35 = vpop.permute.xlu0 %363  ;;  %v259_v36 = vpack.c.bf16 %v255_v28, %v255_v28  ;;  %v238_v37 = vpack.c.bf16 %v235_v27, %v235_v27 }
  0x8c   : > { %v368_v38 = vsel %vm367_vm2, %v364_v35, %v366_v33  ;;  %v369_v39 = vsel %vm367_vm2, %v366_v33, %v364_v35  ;;  %v517_v27 = vsel %vm265_vm3, %v511_v3, 0  ;;  %v2502_v30 = vrot.slane %v2382_v9, %v720_v11  ;;  %v203_v3 = vld [vmem:[%s2325_s20] sm:$0xf] }
  0x8d   : > { %2153 = vmatprep.subr.msk.bf16.mxu1 %vm265_vm3, %v239_v32  ;;  %2151 = vmatprep.subr.msk.bf16.mxu0 %vm265_vm3, %v260_v34  ;;  %v378_v42 = vmul.f32 %v2406_v20, %v369_v39  ;;  %v379_v43 = vmul.f32 %v2409_v21, %v368_v38  ;;  %v267_v44 = vsel %vm265_vm3, %v259_v36, 0  ;;  %v317_v45 = vsel %vm265_vm3, %v238_v37, 0  ;;  %204 = vst [vmem:[%s2574_s5] sm:$0xf] %v203_v3 }
  0x8e   : > { %273 = vmatpush1.bf16.msra.mxu0 %v267_v44  ;;  %323 = vmatpush1.bf16.msra.mxu1 %v317_v45  ;;  %v2510_v34 = vrot.slane %v2387_v10, %v720_v11  ;;  %v2164_v44 = vld [vmem:[%s2903_s0 + $0x5] sm:$0x1]  ;;  %v2532_v45 = vld [vmem:[%s2905_s2 + $0x10] ss:$0 sm:$0xff] }
  0x8f   : > { %v382_v48 = vpack.c.bf16 %v378_v42, %v378_v42  ;;  %v383_v49 = vpack.c.bf16 %v379_v43, %v379_v43  ;;  %v439_v50 = vpop.permute.xlu1 %438  ;;  %v437_v51 = vpop.permute.xlu0 %436  ;;  %v2161_v43 = vld [vmem:[%s2903_s0 + $0x4] sm:$0x1] }
  0x90   : > { %v441_v53 = vsel %vm440_vm4, %v437_v51, %v439_v50  ;;  %v442_v54 = vsel %vm440_vm4, %v439_v50, %v437_v51 }
  0x91   : > { %2154 = vmatmul.mubr.msk.bf16.vlgmr.msra.gmra.mrb[0].mxu1 %vm261_vm5, %v237_v46  ;;  %2152 = vmatmul.mubr.msk.bf16.vlgmr.msra.gmra.mrb[0].mxu0 %vm261_vm5, %v2150_v47  ;;  %v451_v57 = vmul.f32 %v2431_v40, %v442_v54  ;;  %v452_v58 = vmul.f32 %v2434_v41, %v441_v53  ;;  %v388_v59 = vsel %vm265_vm3, %v382_v48, 0  ;;  %v2537_v46 = vld [vmem:[%s2905_s2 + $0x18] ss:$0 sm:$0xff] }
  0x92   : > { %2156 = vmatprep.subr.msk.bf16.mxu0 %vm265_vm3, %v383_v49  ;;  %425 = vmatprep.mubr.bf16.mxu0 %v2274_v1 }
  0x93   : > { %v455_v61 = vpack.c.bf16 %v451_v57, %v451_v57  ;;  %v456_v62 = vpack.c.bf16 %v452_v58, %v452_v58  ;;  %394 = vmatpush1.bf16.msra.mxu0 %v388_v59  ;;  %v568_v63 = vpop.permute.xlu1 %567  ;;  %v566_v2 = vpop.permute.xlu0 %565  ;;  %498 = vmatprep.mubr.bf16.mxu1 %v2274_v1 }
  0x94   : > { %v570_v4 = vsel %vm569_vm6, %v566_v2, %v568_v63  ;;  %v571_v7 = vsel %vm569_vm6, %v568_v63, %v566_v2  ;;  %2162 = vmatprep.subr.msk.bf16.mxu0 %vm265_vm3, %v512_v56  ;;  %v2175_v2 = vld [vmem:[%s2903_s0 + $0x8] sm:$0x1] }
  0x95   : > { %2159 = vmatprep.subr.msk.bf16.mxu1 %vm265_vm3, %v456_v62  ;;  %v461_v12 = vsel %vm265_vm3, %v455_v61, 0  ;;  %v580_v13 = vmul.f32 %v2450_v52, %v570_v4  ;;  %v581_v0 = vmul.f32 %v2465_v60, %v571_v7  ;;  %v2167_v61 = vld [vmem:[%s2903_s0 + $0x6] sm:$0x1]  ;;  %v2170_v62 = vld [vmem:[%s2903_s0 + $0x7] sm:$0x1] }
  0x96   : > { %467 = vmatpush1.bf16.msra.mxu1 %v461_v12 }
  0x97   : > { %v584_v23 = vpack.c.bf16 %v580_v13, %v580_v13  ;;  %v585_v24 = vpack.c.bf16 %v581_v0, %v581_v0  ;;  %v641_v25 = vpop.permute.xlu1 %640  ;;  %v639_v26 = vpop.permute.xlu0 %638 }
  0x98   : > { %v643_v28 = vsel %vm642_vm7, %v639_v26, %v641_v25  ;;  %v644_v29 = vsel %vm642_vm7, %v641_v25, %v639_v26 }
  0x99   : > { %2157 = vmatmul.mubr.msk.bf16.vlgmr.msra.gmra.mrb[4].mxu0 %vm261_vm5, %v2155_v19  ;;  %2160 = vmatmul.mubr.msk.bf16.vlgmr.msra.gmra.mrb[4].mxu1 %vm261_vm5, %v2158_v22  ;;  %v653_v31 = vmul.f32 %v2478_v8, %v643_v28  ;;  %v654_v32 = vmul.f32 %v2487_v18, %v644_v29  ;;  %v590_v33 = vsel %vm265_vm3, %v584_v23, 0 }
  0x9a   : > { %523 = vmatpush1.bf16.msra.mxu0 %v517_v27  ;;  %2165 = vmatprep.subr.msk.bf16.mxu1 %vm265_vm3, %v585_v24 }
  0x9b   : > { %v657_v35 = vpack.c.bf16 %v653_v31, %v653_v31  ;;  %v658_v36 = vpack.c.bf16 %v654_v32, %v654_v32  ;;  %554 = vmatprep.mubr.bf16.mxu0 %v2274_v1  ;;  %596 = vmatpush1.bf16.msra.mxu1 %v590_v33  ;;  %v714_v9 = vpop.permute.xlu1 %713  ;;  %v712_v37 = vpop.permute.xlu0 %711 }
  0x9c   : > { %v716_v38 = vsel %vm715_vm8, %v712_v37, %v714_v9  ;;  %v717_v39 = vsel %vm715_vm8, %v714_v9, %v712_v37  ;;  %627 = vmatprep.mubr.bf16.mxu1 %v2274_v1 }
  0x9d   : > { %v726_v10 = vmul.f32 %v2502_v30, %v716_v38  ;;  %v727_v42 = vmul.f32 %v2510_v34, %v717_v39  ;;  %2168 = vmatprep.subr.msk.bf16.mxu0 %vm265_vm3, %v658_v36  ;;  %v663_v49 = vsel %vm265_vm3, %v657_v35, 0 }
  0x9f   : > { %v730_v47 = vpack.c.bf16 %v726_v10, %v726_v10  ;;  %v731_v48 = vpack.c.bf16 %v727_v42, %v727_v42  ;;  %v787_v50 = vpop.permute.xlu1 %786  ;;  %v785_v51 = vpop.permute.xlu0 %784 }
  0xa0   : > { %v789_v53 = vsel %vm788_vm9, %v785_v51, %v787_v50  ;;  %v790_v54 = vsel %vm788_vm9, %v787_v50, %v785_v51 }
  0xa1   : > { %2163 = vmatmul.mubr.msk.bf16.vlgmr.msra.gmra.mrb[8].mxu0 %vm261_vm5, %v2161_v43  ;;  %2166 = vmatmul.mubr.msk.bf16.vlgmr.msra.gmra.mrb[8].mxu1 %vm261_vm5, %v2164_v44  ;;  %v799_v55 = vmul.f32 %v2532_v45, %v789_v53  ;;  %v800_v56 = vmul.f32 %v2537_v46, %v790_v54  ;;  %v736_v57 = vsel %vm265_vm3, %v730_v47, 0 }
  0xa2   : > { %669 = vmatpush1.bf16.msra.mxu0 %v663_v49  ;;  %2171 = vmatprep.subr.msk.bf16.mxu1 %vm265_vm3, %v731_v48 }
  0xa3   : > { %v803_v58 = vpack.c.bf16 %v799_v55, %v799_v55  ;;  %v804_v59 = vpack.c.bf16 %v800_v56, %v800_v56  ;;  %700 = vmatprep.mubr.bf16.mxu0 %v2274_v1  ;;  %742 = vmatpush1.bf16.msra.mxu1 %v736_v57 }
  0xa4   : > { %773 = vmatprep.mubr.bf16.mxu1 %v2274_v1 }
  0xa5   : > { %2176 = vmatprep.subr.msk.bf16.mxu0 %vm265_vm3, %v804_v59  ;;  %v809_v63 = vsel %vm265_vm3, %v803_v58, 0 }
  0xa9   : > { %2169 = vmatmul.mubr.msk.bf16.vlgmr.msra.gmra.mrb[12].mxu0 %vm261_vm5, %v2167_v61  ;;  %2172 = vmatmul.mubr.msk.bf16.vlgmr.msra.gmra.mrb[12].mxu1 %vm261_vm5, %v2170_v62 }
  0xaa   : > { %815 = vmatpush1.bf16.msra.mxu0 %v809_v63  ;;  %846 = vmatprep.mubr.bf16.mxu0 %v2274_v1 }
  0xab   : > { %959 = vmatprep.mubr.bf16.mxu1 %v2274_v1 }
  0xb1   : > { %2177 = vmatmul.mubr.msk.bf16.vlgmr.msra.gmra.mrb[16].mxu0 %vm261_vm5, %v2175_v2 }
  0xb2   : > { %1009 = vmatprep.mubr.bf16.mxu0 %v2274_v1 }
 0x164   : > { %v306_v4 = vpop.f32.mrb[0].mxu0  ;;  %v356_v7 = vpop.f32.mrb[0].mxu1 }
 0x165   : > { %v357_v11 = vadd.f32 %v356_v7, %v306_v4  ;;  %v308_v12 = vpop.f32.mrb[1].mxu0  ;;  %v358_v13 = vpop.f32.mrb[1].mxu1  ;;  %v2283_v7 = vmov 1983009808  }
 0x166   : > { %v359_v0 = vadd.f32 %v358_v13, %v308_v12  ;;  %v310_v19 = vpop.f32.mrb[2].mxu0  ;;  %v360_v22 = vpop.f32.mrb[2].mxu1 }
 0x167   : > { %v311_v23 = vpop.f32.mrb[3].mxu0  ;;  %v361_v24 = vpop.f32.mrb[3].mxu1 }
 0x168   : > { %v861_v13 = vpop.permute.xlu0 %860 }
 0x16c   : > { %v427_v25 = vpop.f32.mrb[4].mxu0  ;;  %v500_v26 = vpop.f32.mrb[4].mxu1 }
 0x16d   : > { %v434_v27 = vadd.f32 %v427_v25, %v357_v11  ;;  %v429_v28 = vpop.f32.mrb[5].mxu0  ;;  %v502_v29 = vpop.f32.mrb[5].mxu1  ;;  %v871_v11 = vunpack.c.l.s4 %v2283_v7 }
 0x16e   : > { %v435_v31 = vadd.f32 %v429_v28, %v359_v0  ;;  %v431_v32 = vpop.f32.mrb[6].mxu0  ;;  %v504_v33 = vpop.f32.mrb[6].mxu1 }
 0x16f   : > { %v507_v35 = vadd.f32 %v500_v26, %v434_v27  ;;  %v432_v36 = vpop.f32.mrb[7].mxu0  ;;  %v505_v9 = vpop.f32.mrb[7].mxu1  ;;  %v872_v23 = vunpack.c.0.s8 %v871_v11  ;;  %v2179_v33 = vld [vmem:[%s2325_s20 + $0x8] sm:$0xf] }
 0x170   : > { %v508_v37 = vadd.f32 %v502_v29, %v435_v31 }
 0x171   : > { %v2579_v29 = vsub.s32 %v872_v23, %v2373_v5 }
 0x174   : > { %v556_v38 = vpop.f32.mrb[8].mxu0  ;;  %v629_v39 = vpop.f32.mrb[8].mxu1 }
 0x175   : > { %v563_v10 = vadd.f32 %v556_v38, %v507_v35  ;;  %v558_v42 = vpop.f32.mrb[9].mxu0  ;;  %v631_v43 = vpop.f32.mrb[9].mxu1 }
 0x176   : > { %v564_v44 = vadd.f32 %v558_v42, %v508_v37  ;;  %v560_v47 = vpop.f32.mrb[10].mxu0  ;;  %v633_v48 = vpop.f32.mrb[10].mxu1  ;;  %v2207_v37 = vld [vmem:[%s2904_s1 + $0x2] sm:$0x3] }
 0x177   : > { %v636_v49 = vadd.f32 %v629_v39, %v563_v10  ;;  %v561_v50 = vpop.f32.mrb[11].mxu0  ;;  %v634_v51 = vpop.f32.mrb[11].mxu1 }
 0x178   : > { %v637_v53 = vadd.f32 %v631_v43, %v564_v44 }
 0x17c   : > { %v702_v54 = vpop.f32.mrb[12].mxu0  ;;  %v775_v55 = vpop.f32.mrb[12].mxu1 }
 0x17d   : > { %v709_v56 = vadd.f32 %v702_v54, %v636_v49  ;;  %v704_v57 = vpop.f32.mrb[13].mxu0  ;;  %v777_v58 = vpop.f32.mrb[13].mxu1 }
 0x17e   : > { %v710_v59 = vadd.f32 %v704_v57, %v637_v53  ;;  %v706_v61 = vpop.f32.mrb[14].mxu0  ;;  %v779_v62 = vpop.f32.mrb[14].mxu1 }
 0x17f   : > { %v782_v63 = vadd.f32 %v775_v55, %v709_v56  ;;  %v707_v2 = vpop.f32.mrb[15].mxu0  ;;  %v780_v3 = vpop.f32.mrb[15].mxu1 }
 0x180   : > { %v783_v4 = vadd.f32 %v777_v58, %v710_v59  ;;  %v2181_v59 = vld [vmem:[%s2903_s0 + $0xa] sm:$0x1] }
 0x184   : > { %v848_v12 = vpop.f32.mrb[16].mxu0 }
 0x185   : > { %v855_v0 = vadd.f32 %v848_v12, %v782_v63  ;;  %v850_v19 = vpop.f32.mrb[17].mxu0 }
 0x186   : > { %v856_v22 = vadd.f32 %v850_v19, %v783_v4  ;;  %v852_v24 = vpop.f32.mrb[18].mxu0 }
 0x187   : > { %v863_v25 = vadd.f32 %v861_v13, %v855_v0  ;;  %v853_v26 = vpop.f32.mrb[19].mxu0 }
 0x188   : > { %v864_v27 = vadd.f32 %v861_v13, %v856_v22  ;;  %v2180_v13 = vld [vmem:[%s2903_s0 + $0x9] sm:$0x1] }
 0x189   : > { %v865_v28 = vmax.f32 %v863_v25, 0.0 }
 0x18a   : > { %v866_v31 = vmax.f32 %v864_v27, 0.0 }
 0x18c   : > { %v869_v32 = vcombine.low %v865_v28, %v866_v31 }
 0x18e   : > { %v876_v35 = vrot.slane %v869_v32, %v2579_v29  ;;  %2243 = vst.sshfl [vmem:[%s2574_s5 + $0x4] sm:$0x33 pattern:$0x76325410] %v869_v32  ;;  %v2186_v32 = vld [vmem:[%s2903_s0 + $0xb] sm:$0x1] }
 0x190   : > { %v882_v36 = vadd.f32 %v2179_v33, %v876_v35 }
 0x192   : > { %v2585_v9 = vrot.slane %v882_v36, %v2579_v29 }
 0x194   : > { %894 = vrot.lane.b32.xlu0 %v2585_v9, %s2275_s21  ;;  %906 = vrot.lane.b32.xlu1 %v2585_v9, %s2276_s22  ;;  %v2593_v5 = vcombine.high %v2585_v9, %v2585_v9  ;;  %v1148_v25 = vpack.c.bf16 %v2585_v9, %v2585_v9 }
 0x196   : > { %v1149_v31 = vpack.c.bf16 %v2593_v5, %v2593_v5 }
 0x198   : > { %1018 = vrot.lane.b32.xlu0 %v2585_v9, %s2277_s23  ;;  %908 = vrot.lane.b32.xlu1 %v2593_v5, %s2276_s22 }
 0x19c   : > { %1082 = vrot.lane.b32.xlu0 %v2585_v9, %s2278_s24  ;;  %896 = vrot.lane.b32.xlu1 %v2593_v5, %s2275_s21 }
 0x1a0   : > { %1202 = vrot.lane.b32.xlu0 %v2585_v9, %s2279_s25  ;;  %1020 = vrot.lane.b32.xlu1 %v2593_v5, %s2277_s23 }
 0x1a4   : > { %1266 = vrot.lane.b32.xlu0 %v2585_v9, %s2280_s26  ;;  %1084 = vrot.lane.b32.xlu1 %v2593_v5, %s2278_s24 }
 0x1a8   : > { %1330 = vrot.lane.b32.xlu0 %v2585_v9, %s2281_s27  ;;  %1204 = vrot.lane.b32.xlu1 %v2593_v5, %s2279_s25 }
 0x1ac   : > { %1394 = vrot.lane.b32.xlu0 %v2585_v9, %s2282_s28  ;;  %1268 = vrot.lane.b32.xlu1 %v2593_v5, %s2280_s26 }
 0x1b0   : > { %1462 = vperm.xlu0 %2264, %v2207_v37   ;;  %1332 = vrot.lane.b32.xlu1 %v2593_v5, %s2281_s27 }
 0x1b4   : > { %1396 = vrot.lane.b32.xlu1 %v2593_v5, %s2282_s28 }
 0x206   : > { %v895_v38 = vpop.permute.xlu0 %894  ;;  %v907_v39 = vpop.permute.xlu1 %906 }
 0x20a   : > { %v1019_v10 = vpop.permute.xlu0 %1018  ;;  %v909_v42 = vpop.permute.xlu1 %908 }
 0x20b   : > { %v910_v43 = vsel %vm244_vm1, %v907_v39, %v909_v42  ;;  %v911_v44 = vsel %vm244_vm1, %v909_v42, %v907_v39  ;;  %v1154_v42 = vsel %vm265_vm3, %v1148_v25, 0  ;;  %v2198_v25 = vld [vmem:[%s2903_s0 + $0xf] sm:$0x1] }
 0x20c   : > { %v912_v47 = vmul.f32 %v911_v44, %v2396_v15  ;;  %v913_v48 = vmul.f32 %v910_v43, %v2402_v17  ;;  %v2189_v43 = vld [vmem:[%s2903_s0 + $0xc] sm:$0x1] }
 0x20e   : > { %v916_v49 = vpack.c.bf16 %v912_v47, %v912_v47  ;;  %v917_v50 = vpack.c.bf16 %v913_v48, %v913_v48  ;;  %v1083_v51 = vpop.permute.xlu0 %1082  ;;  %v897_v53 = vpop.permute.xlu1 %896 }
 0x20f   : > { %v898_v54 = vsel %vm224_vm0, %v895_v38, %v897_v53  ;;  %v899_v55 = vsel %vm224_vm0, %v897_v53, %v895_v38 }
 0x210   : > { %v900_v56 = vmul.f32 %v899_v55, %v2393_v14  ;;  %v901_v57 = vmul.f32 %v898_v54, %v2399_v16  ;;  %2182 = vmatprep.subr.msk.bf16.mxu1 %vm265_vm3, %v917_v50  ;;  %v922_v58 = vsel %vm265_vm3, %v916_v49, 0 }
 0x211   : > { %928 = vmatpush1.bf16.msra.mxu1 %v922_v58 }
 0x212   : > { %v904_v61 = vpack.c.bf16 %v900_v56, %v900_v56  ;;  %v905_v62 = vpack.c.bf16 %v901_v57, %v901_v57  ;;  %v1021_v63 = vpop.permute.xlu1 %1020  ;;  %v1203_v4 = vpop.permute.xlu0 %1202  ;;  %v2192_v56 = vld [vmem:[%s2903_s0 + $0xd] sm:$0x1] }
 0x213   : > { %v1022_v2 = vsel %vm367_vm2, %v1019_v10, %v1021_v63  ;;  %v1023_v3 = vsel %vm367_vm2, %v1021_v63, %v1019_v10 }
 0x214   : > { %v1024_v7 = vmul.f32 %v1023_v3, %v2406_v20  ;;  %v1025_v11 = vmul.f32 %v1022_v2, %v2409_v21  ;;  %2183 = vmatmul.mubr.msk.bf16.vlgmr.msra.gmra.mrb[16].mxu1 %vm261_vm5, %v2181_v59  ;;  %2184 = vmatprep.subr.msk.bf16.mxu0 %vm265_vm3, %v905_v62  ;;  %v972_v12 = vsel %vm265_vm3, %v904_v61, 0 }
 0x215   : > { %978 = vmatpush1.bf16.msra.mxu0 %v972_v12  ;;  %1071 = vmatprep.mubr.bf16.mxu1 %v2274_v1 }
 0x216   : > { %v1028_v0 = vpack.c.bf16 %v1024_v7, %v1024_v7  ;;  %v1029_v19 = vpack.c.bf16 %v1025_v11, %v1025_v11  ;;  %v1085_v22 = vpop.permute.xlu1 %1084  ;;  %v1267_v33 = vpop.permute.xlu0 %1266 }
 0x217   : > { %v1086_v23 = vsel %vm440_vm4, %v1083_v51, %v1085_v22  ;;  %v1087_v24 = vsel %vm440_vm4, %v1085_v22, %v1083_v51 }
 0x218   : > { %v1088_v26 = vmul.f32 %v1087_v24, %v2431_v40  ;;  %v1089_v27 = vmul.f32 %v1086_v23, %v2434_v41  ;;  %2185 = vmatmul.mubr.msk.bf16.vlgmr.msra.gmra.mrb[20].mxu0 %vm261_vm5, %v2180_v13  ;;  %2187 = vmatprep.subr.msk.bf16.mxu1 %vm265_vm3, %v1029_v19  ;;  %v1034_v28 = vsel %vm265_vm3, %v1028_v0, 0 }
 0x219   : > { %1040 = vmatpush1.bf16.msra.mxu1 %v1034_v28  ;;  %1135 = vmatprep.mubr.bf16.mxu0 %v2274_v1 }
 0x21a   : > { %v1092_v35 = vpack.c.bf16 %v1088_v26, %v1088_v26  ;;  %v1093_v36 = vpack.c.bf16 %v1089_v27, %v1089_v27  ;;  %v1205_v9 = vpop.permute.xlu1 %1204  ;;  %2193 = vmatprep.subr.msk.bf16.mxu1 %vm265_vm3, %v1149_v31  ;;  %v1331_v51 = vpop.permute.xlu0 %1330  ;;  %v2201_v31 = vld [vmem:[%s2903_s0 + $0x10] sm:$0x1] }
 0x21b   : > { %v1206_v37 = vsel %vm569_vm6, %v1203_v4, %v1205_v9  ;;  %v1207_v38 = vsel %vm569_vm6, %v1205_v9, %v1203_v4  ;;  %v2195_v4 = vld [vmem:[%s2903_s0 + $0xe] sm:$0x1] }
 0x21c   : > { %v1208_v5 = vmul.f32 %v1206_v37, %v2450_v52  ;;  %v1209_v39 = vmul.f32 %v1207_v38, %v2465_v60  ;;  %2188 = vmatmul.mubr.msk.bf16.vlgmr.msra.gmra.mrb[20].mxu1 %vm261_vm5, %v2186_v32  ;;  %2190 = vmatprep.subr.msk.bf16.mxu0 %vm265_vm3, %v1093_v36  ;;  %v1098_v10 = vsel %vm265_vm3, %v1092_v35, 0  ;;  %v2204_v32 = vld [vmem:[%s2903_s0 + $0x11] sm:$0x1] }
 0x21d   : > { %1104 = vmatpush1.bf16.msra.mxu0 %v1098_v10  ;;  %1160 = vmatpush1.bf16.msra.mxu1 %v1154_v42 }
 0x21e   : > { %v1212_v44 = vpack.c.bf16 %v1208_v5, %v1208_v5  ;;  %v1213_v47 = vpack.c.bf16 %v1209_v39, %v1209_v39  ;;  %v1269_v48 = vpop.permute.xlu1 %1268  ;;  %1191 = vmatprep.mubr.bf16.mxu1 %v2274_v1  ;;  %v1395_v7 = vpop.permute.xlu0 %1394 }
 0x21f   : > { %v1270_v49 = vsel %vm642_vm7, %v1267_v33, %v1269_v48  ;;  %v1271_v50 = vsel %vm642_vm7, %v1269_v48, %v1267_v33 }
 0x220   : > { %v1272_v53 = vmul.f32 %v1270_v49, %v2478_v8  ;;  %v1273_v54 = vmul.f32 %v1271_v50, %v2487_v18  ;;  %2191 = vmatmul.mubr.msk.bf16.vlgmr.msra.gmra.mrb[24].mxu0 %vm261_vm5, %v2189_v43  ;;  %2196 = vmatprep.subr.msk.bf16.mxu0 %vm265_vm3, %v1213_v47  ;;  %v1218_v55 = vsel %vm265_vm3, %v1212_v44, 0 }
 0x221   : > { %1224 = vmatpush1.bf16.msra.mxu0 %v1218_v55  ;;  %1255 = vmatprep.mubr.bf16.mxu0 %v2274_v1 }
 0x222   : > { %v1276_v57 = vpack.c.bf16 %v1272_v53, %v1272_v53  ;;  %v1277_v58 = vpack.c.bf16 %v1273_v54, %v1273_v54  ;;  %v1333_v59 = vpop.permute.xlu1 %1332 }
 0x223   : > { %v1334_v61 = vsel %vm715_vm8, %v1331_v51, %v1333_v59  ;;  %v1335_v62 = vsel %vm715_vm8, %v1333_v59, %v1331_v51 }
 0x224   : > { %v1336_v63 = vmul.f32 %v1334_v61, %v2502_v30  ;;  %v1337_v2 = vmul.f32 %v1335_v62, %v2510_v34  ;;  %2194 = vmatmul.mubr.msk.bf16.vlgmr.msra.gmra.mrb[24].mxu1 %vm261_vm5, %v2192_v56  ;;  %2199 = vmatprep.subr.msk.bf16.mxu1 %vm265_vm3, %v1277_v58  ;;  %v1282_v3 = vsel %vm265_vm3, %v1276_v57, 0 }
 0x225   : > { %1288 = vmatpush1.bf16.msra.mxu1 %v1282_v3  ;;  %1319 = vmatprep.mubr.bf16.mxu1 %v2274_v1 }
 0x226   : > { %v1340_v11 = vpack.c.bf16 %v1336_v63, %v1336_v63  ;;  %v1341_v12 = vpack.c.bf16 %v1337_v2, %v1337_v2  ;;  %v1397_v13 = vpop.permute.xlu1 %1396 }
 0x227   : > { %v1398_v0 = vsel %vm788_vm9, %v1395_v7, %v1397_v13  ;;  %v1399_v19 = vsel %vm788_vm9, %v1397_v13, %v1395_v7 }
 0x228   : > { %v1400_v22 = vmul.f32 %v2532_v45, %v1398_v0  ;;  %v1401_v23 = vmul.f32 %v2537_v46, %v1399_v19  ;;  %2197 = vmatmul.mubr.msk.bf16.vlgmr.msra.gmra.mrb[28].mxu0 %vm261_vm5, %v2195_v4  ;;  %2202 = vmatprep.subr.msk.bf16.mxu0 %vm265_vm3, %v1341_v12  ;;  %v1346_v24 = vsel %vm265_vm3, %v1340_v11, 0 }
 0x229   : > { %1352 = vmatpush1.bf16.msra.mxu0 %v1346_v24  ;;  %1383 = vmatprep.mubr.bf16.mxu0 %v2274_v1 }
 0x22a   : > { %v1404_v26 = vpack.c.bf16 %v1400_v22, %v1400_v22  ;;  %v1405_v27 = vpack.c.bf16 %v1401_v23, %v1401_v23 }
 0x22c   : > { %2200 = vmatmul.mubr.msk.bf16.vlgmr.msra.gmra.mrb[28].mxu1 %vm261_vm5, %v2198_v25  ;;  %2205 = vmatprep.subr.msk.bf16.mxu1 %vm265_vm3, %v1405_v27  ;;  %v1410_v28 = vsel %vm265_vm3, %v1404_v26, 0 }
 0x22d   : > { %1416 = vmatpush1.bf16.msra.mxu1 %v1410_v28  ;;  %1447 = vmatprep.mubr.bf16.mxu1 %v2274_v1 }
 0x230   : > { %2203 = vmatmul.mubr.msk.bf16.vlgmr.msra.gmra.mrb[32].mxu0 %vm261_vm5, %v2201_v31 }
 0x231   : > { %1561 = vmatprep.mubr.bf16.mxu0 %v2274_v1 }
 0x234   : > { %2206 = vmatmul.mubr.msk.bf16.vlgmr.msra.gmra.mrb[32].mxu1 %vm261_vm5, %v2204_v32 }
 0x235   : > { %1611 = vmatprep.mubr.bf16.mxu1 %v2274_v1 }
 0x2e7   : > { %v961_v33 = vpop.f32.mrb[16].mxu1 }
 0x2e8   : > { %v963_v35 = vpop.f32.mrb[17].mxu1 }
 0x2e9   : > { %v965_v36 = vpop.f32.mrb[18].mxu1 }
 0x2ea   : > { %v966_v9 = vpop.f32.mrb[19].mxu1 }
 0x2eb   : > { %v1011_v37 = vpop.f32.mrb[20].mxu0 }
 0x2ec   : > { %v1012_v38 = vadd.f32 %v1011_v37, %v961_v33  ;;  %v1013_v5 = vpop.f32.mrb[21].mxu0  ;;  %v1463_v37 = vpop.permute.xlu0 %1462 }
 0x2ed   : > { %v1014_v39 = vadd.f32 %v1013_v5, %v963_v35  ;;  %v1015_v10 = vpop.f32.mrb[22].mxu0 }
 0x2ee   : > { %v1016_v42 = vpop.f32.mrb[23].mxu0 }
 0x2ef   : > { %v1073_v43 = vpop.f32.mrb[20].mxu1 }
 0x2f0   : > { %v1080_v44 = vadd.f32 %v1073_v43, %v1012_v38  ;;  %v1075_v47 = vpop.f32.mrb[21].mxu1 }
 0x2f1   : > { %v1081_v48 = vadd.f32 %v1075_v47, %v1014_v39  ;;  %v1077_v49 = vpop.f32.mrb[22].mxu1 }
 0x2f2   : > { %v1078_v50 = vpop.f32.mrb[23].mxu1 }
 0x2f3   : > { %v1137_v51 = vpop.f32.mrb[24].mxu0 }
 0x2f4   : > { %v1144_v53 = vadd.f32 %v1137_v51, %v1080_v44  ;;  %v1139_v54 = vpop.f32.mrb[25].mxu0 }
 0x2f5   : > { %v1145_v55 = vadd.f32 %v1139_v54, %v1081_v48  ;;  %v1141_v56 = vpop.f32.mrb[26].mxu0  ;;  %v2209_v48 = vld [vmem:[%s2325_s20 + $0xc] sm:$0xf] }
 0x2f6   : > { %v1142_v57 = vpop.f32.mrb[27].mxu0 }
 0x2f7   : > { %v1193_v58 = vpop.f32.mrb[24].mxu1 }
 0x2f8   : > { %v1200_v59 = vadd.f32 %v1193_v58, %v1144_v53  ;;  %v1195_v61 = vpop.f32.mrb[25].mxu1 }
 0x2f9   : > { %v1201_v62 = vadd.f32 %v1195_v61, %v1145_v55  ;;  %v1197_v63 = vpop.f32.mrb[26].mxu1 }
 0x2fa   : > { %v1198_v2 = vpop.f32.mrb[27].mxu1 }
 0x2fb   : > { %v1257_v3 = vpop.f32.mrb[28].mxu0 }
 0x2fc   : > { %v1264_v4 = vadd.f32 %v1257_v3, %v1200_v59  ;;  %v1259_v7 = vpop.f32.mrb[29].mxu0 }
 0x2fd   : > { %v1265_v11 = vadd.f32 %v1259_v7, %v1201_v62  ;;  %v1261_v12 = vpop.f32.mrb[30].mxu0 }
 0x2fe   : > { %v1262_v13 = vpop.f32.mrb[31].mxu0 }
 0x2ff   : > { %v1321_v0 = vpop.f32.mrb[28].mxu1 }
 0x300   : > { %v1328_v19 = vadd.f32 %v1321_v0, %v1264_v4  ;;  %v1323_v22 = vpop.f32.mrb[29].mxu1 }
 0x301   : > { %v1329_v23 = vadd.f32 %v1323_v22, %v1265_v11  ;;  %v1325_v24 = vpop.f32.mrb[30].mxu1 }
 0x302   : > { %v1326_v25 = vpop.f32.mrb[31].mxu1 }
 0x303   : > { %v1385_v26 = vpop.f32.mrb[32].mxu0 }
 0x304   : > { %v1392_v27 = vadd.f32 %v1385_v26, %v1328_v19  ;;  %v1387_v28 = vpop.f32.mrb[33].mxu0  ;;  %v2210_v26 = vld [vmem:[%s2903_s0 + $0x12] sm:$0x1] }
 0x305   : > { %v1393_v31 = vadd.f32 %v1387_v28, %v1329_v23  ;;  %v1389_v32 = vpop.f32.mrb[34].mxu0 }
 0x306   : > { %v1390_v33 = vpop.f32.mrb[35].mxu0 }
 0x307   : > { %v1449_v35 = vpop.f32.mrb[32].mxu1 }
 0x308   : > { %v1456_v36 = vadd.f32 %v1449_v35, %v1392_v27  ;;  %v1451_v9 = vpop.f32.mrb[33].mxu1 }
 0x309   : > { %v1457_v38 = vadd.f32 %v1451_v9, %v1393_v31  ;;  %v1453_v5 = vpop.f32.mrb[34].mxu1 }
 0x30a   : > { %v1465_v39 = vadd.f32 %v1463_v37, %v1456_v36  ;;  %v1454_v10 = vpop.f32.mrb[35].mxu1 }
 0x30b   : > { %v1466_v42 = vadd.f32 %v1463_v37, %v1457_v38  ;;  %v2216_v38 = vld [vmem:[%s2903_s0 + $0x14] sm:$0x1] }
 0x30c   : > { %v1467_v43 = vmax.f32 %v1465_v39, 0.0 }
 0x30d   : > { %v1468_v44 = vmax.f32 %v1466_v42, 0.0 }
 0x30f   : > { %v1471_v47 = vcombine.low %v1467_v43, %v1468_v44 }
 0x311   : > { %v1478_v49 = vrot.slane %v1471_v47, %v2579_v29  ;;  %2244 = vst.sshfl [vmem:[%s2574_s5 + $0x8] sm:$0x33 pattern:$0x76325410] %v1471_v47 }
 0x313   : > { %v1484_v50 = vadd.f32 %v2209_v48, %v1478_v49  ;;  %v2219_v49 = vld [vmem:[%s2903_s0 + $0x15] sm:$0x1] }
 0x315   : > { %v2745_v51 = vrot.slane %v1484_v50, %v2579_v29  ;;  %v2237_v29 = vld [vmem:[%s2904_s1 + $0x4] sm:$0x3] }
 0x317   : > { %1508 = vrot.lane.b32.xlu1 %v2745_v51, %s2276_s22  ;;  %v2751_v53 = vcombine.high %v2745_v51, %v2745_v51  ;;  %v1750_v32 = vpack.c.bf16 %v2745_v51, %v2745_v51 }
 0x319   : > { %1510 = vrot.lane.b32.xlu0 %v2751_v53, %s2276_s22  ;;  %v1751_v37 = vpack.c.bf16 %v2751_v53, %v2751_v53  ;;  %v1756_v48 = vsel %vm265_vm3, %v1750_v32, 0 }
 0x31b   : > { %1496 = vrot.lane.b32.xlu1 %v2745_v51, %s2275_s21 }
 0x31d   : > { %1498 = vrot.lane.b32.xlu0 %v2751_v53, %s2275_s21 }
 0x31f   : > { %1620 = vrot.lane.b32.xlu1 %v2745_v51, %s2277_s23 }
 0x321   : > { %1622 = vrot.lane.b32.xlu0 %v2751_v53, %s2277_s23 }
 0x323   : > { %1684 = vrot.lane.b32.xlu1 %v2745_v51, %s2278_s24 }
 0x325   : > { %1686 = vrot.lane.b32.xlu0 %v2751_v53, %s2278_s24 }
 0x327   : > { %1804 = vrot.lane.b32.xlu1 %v2745_v51, %s2279_s25 }
 0x329   : > { %1806 = vrot.lane.b32.xlu0 %v2751_v53, %s2279_s25 }
 0x32b   : > { %1868 = vrot.lane.b32.xlu1 %v2745_v51, %s2280_s26 }
 0x32d   : > { %1870 = vrot.lane.b32.xlu0 %v2751_v53, %s2280_s26 }
 0x32f   : > { %1932 = vrot.lane.b32.xlu1 %v2745_v51, %s2281_s27 }
 0x331   : > { %1934 = vrot.lane.b32.xlu0 %v2751_v53, %s2281_s27 }
 0x333   : > { %1996 = vrot.lane.b32.xlu1 %v2745_v51, %s2282_s28 }
 0x335   : > { %1998 = vrot.lane.b32.xlu0 %v2751_v53, %s2282_s28 }
 0x337   : > { %2064 = vperm.xlu1 %2265, %v2237_v29  }
 0x389   : > { %v1509_v54 = vpop.permute.xlu1 %1508 }
 0x38b   : > { %v1511_v55 = vpop.permute.xlu0 %1510 }
 0x38c   : > { %v1512_v56 = vsel %vm244_vm1, %v1509_v54, %v1511_v55  ;;  %v1513_v57 = vsel %vm244_vm1, %v1511_v55, %v1509_v54 }
 0x38d   : > { %v1514_v58 = vmul.f32 %v1513_v57, %v2396_v15  ;;  %v1515_v59 = vmul.f32 %v1512_v56, %v2402_v17  ;;  %v1497_v61 = vpop.permute.xlu1 %1496  ;;  %v2211_v17 = vld [vmem:[%s2903_s0 + $0x13] sm:$0x1]  ;;  %v2222_v57 = vld [vmem:[%s2903_s0 + $0x16] sm:$0x1] }
 0x38f   : > { %v1518_v62 = vpack.c.bf16 %v1514_v58, %v1514_v58  ;;  %v1519_v63 = vpack.c.bf16 %v1515_v59, %v1515_v59  ;;  %v1499_v2 = vpop.permute.xlu0 %1498 }
 0x390   : > { %v1500_v3 = vsel %vm224_vm0, %v1497_v61, %v1499_v2  ;;  %v1501_v4 = vsel %vm224_vm0, %v1499_v2, %v1497_v61 }
 0x391   : > { %v1502_v7 = vmul.f32 %v1501_v4, %v2393_v14  ;;  %v1503_v11 = vmul.f32 %v1500_v3, %v2399_v16  ;;  %v1621_v12 = vpop.permute.xlu1 %1620  ;;  %2212 = vmatprep.subr.msk.bf16.mxu0 %vm265_vm3, %v1519_v63  ;;  %v1524_v15 = vsel %vm265_vm3, %v1518_v62, 0  ;;  %v2225_v3 = vld [vmem:[%s2903_s0 + $0x17] sm:$0x1] }
 0x392   : > { %1530 = vmatpush1.bf16.msra.mxu0 %v1524_v15 }
 0x393   : > { %v1506_v13 = vpack.c.bf16 %v1502_v7, %v1502_v7  ;;  %v1507_v0 = vpack.c.bf16 %v1503_v11, %v1503_v11  ;;  %v1623_v19 = vpop.permute.xlu0 %1622 }
 0x394   : > { %v1624_v22 = vsel %vm367_vm2, %v1621_v12, %v1623_v19  ;;  %v1625_v14 = vsel %vm367_vm2, %v1623_v19, %v1621_v12 }
 0x395   : > { %v1626_v16 = vmul.f32 %v1625_v14, %v2406_v20  ;;  %v1627_v23 = vmul.f32 %v1624_v22, %v2409_v21  ;;  %v1685_v24 = vpop.permute.xlu1 %1684  ;;  %2213 = vmatmul.mubr.msk.bf16.vlgmr.msra.gmra.mrb[36].mxu0 %vm261_vm5, %v2211_v17  ;;  %2214 = vmatprep.subr.msk.bf16.mxu1 %vm265_vm3, %v1507_v0  ;;  %v1574_v25 = vsel %vm265_vm3, %v1506_v13, 0  ;;  %v2228_v0 = vld [vmem:[%s2903_s0 + $0x18] sm:$0x1]  ;;  %v2234_v22 = vld [vmem:[%s2903_s0 + $0x1a] sm:$0x1] }
 0x396   : > { %1580 = vmatpush1.bf16.msra.mxu1 %v1574_v25  ;;  %1673 = vmatprep.mubr.bf16.mxu0 %v2274_v1 }
 0x397   : > { %v1630_v27 = vpack.c.bf16 %v1626_v16, %v1626_v16  ;;  %v1631_v28 = vpack.c.bf16 %v1627_v23, %v1627_v23  ;;  %v1687_v31 = vpop.permute.xlu0 %1686 }
 0x398   : > { %v1688_v20 = vsel %vm440_vm4, %v1685_v24, %v1687_v31  ;;  %v1689_v21 = vsel %vm440_vm4, %v1687_v31, %v1685_v24 }
 0x399   : > { %v1690_v33 = vmul.f32 %v1689_v21, %v2431_v40  ;;  %v1691_v35 = vmul.f32 %v1688_v20, %v2434_v41  ;;  %v1805_v36 = vpop.permute.xlu1 %1804  ;;  %2215 = vmatmul.mubr.msk.bf16.vlgmr.msra.gmra.mrb[36].mxu1 %vm261_vm5, %v2210_v26  ;;  %2217 = vmatprep.subr.msk.bf16.mxu0 %vm265_vm3, %v1631_v28  ;;  %v1636_v9 = vsel %vm265_vm3, %v1630_v27, 0 }
 0x39a   : > { %1642 = vmatpush1.bf16.msra.mxu0 %v1636_v9  ;;  %1737 = vmatprep.mubr.bf16.mxu1 %v2274_v1 }
 0x39b   : > { %v1694_v40 = vpack.c.bf16 %v1690_v33, %v1690_v33  ;;  %v1695_v5 = vpack.c.bf16 %v1691_v35, %v1691_v35  ;;  %v1807_v41 = vpop.permute.xlu0 %1806  ;;  %2223 = vmatprep.subr.msk.bf16.mxu0 %vm265_vm3, %v1751_v37 }
 0x39c   : > { %v1808_v39 = vsel %vm569_vm6, %v1805_v36, %v1807_v41  ;;  %v1809_v10 = vsel %vm569_vm6, %v1807_v41, %v1805_v36 }
 0x39d   : > { %v1810_v42 = vmul.f32 %v1808_v39, %v2450_v52  ;;  %v1811_v43 = vmul.f32 %v1809_v10, %v2465_v60  ;;  %v1869_v44 = vpop.permute.xlu1 %1868  ;;  %2218 = vmatmul.mubr.msk.bf16.vlgmr.msra.gmra.mrb[40].mxu0 %vm261_vm5, %v2216_v38  ;;  %2220 = vmatprep.subr.msk.bf16.mxu1 %vm265_vm3, %v1695_v5  ;;  %v1700_v47 = vsel %vm265_vm3, %v1694_v40, 0 }
 0x39e   : > { %1706 = vmatpush1.bf16.msra.mxu1 %v1700_v47  ;;  %1762 = vmatpush1.bf16.msra.mxu0 %v1756_v48 }
 0x39f   : > { %v1814_v50 = vpack.c.bf16 %v1810_v42, %v1810_v42  ;;  %v1815_v51 = vpack.c.bf16 %v1811_v43, %v1811_v43  ;;  %v1871_v52 = vpop.permute.xlu0 %1870  ;;  %1793 = vmatprep.mubr.bf16.mxu0 %v2274_v1 }
 0x3a0   : > { %v1872_v60 = vsel %vm642_vm7, %v1869_v44, %v1871_v52  ;;  %v1873_v53 = vsel %vm642_vm7, %v1871_v52, %v1869_v44 }
 0x3a1   : > { %v1874_v29 = vmul.f32 %v1872_v60, %v2478_v8  ;;  %v1875_v54 = vmul.f32 %v1873_v53, %v2487_v18  ;;  %v1933_v55 = vpop.permute.xlu1 %1932  ;;  %2221 = vmatmul.mubr.msk.bf16.vlgmr.msra.gmra.mrb[40].mxu1 %vm261_vm5, %v2219_v49  ;;  %2226 = vmatprep.subr.msk.bf16.mxu1 %vm265_vm3, %v1815_v51  ;;  %v1820_v56 = vsel %vm265_vm3, %v1814_v50, 0 }
 0x3a2   : > { %1826 = vmatpush1.bf16.msra.mxu1 %v1820_v56  ;;  %1857 = vmatprep.mubr.bf16.mxu1 %v2274_v1 }
 0x3a3   : > { %v1878_v58 = vpack.c.bf16 %v1874_v29, %v1874_v29  ;;  %v1879_v59 = vpack.c.bf16 %v1875_v54, %v1875_v54  ;;  %v1935_v61 = vpop.permute.xlu0 %1934 }
 0x3a4   : > { %v1936_v8 = vsel %vm715_vm8, %v1933_v55, %v1935_v61  ;;  %v1937_v18 = vsel %vm715_vm8, %v1935_v61, %v1933_v55 }
 0x3a5   : > { %v1938_v62 = vmul.f32 %v1936_v8, %v2502_v30  ;;  %v1939_v63 = vmul.f32 %v1937_v18, %v2510_v34  ;;  %2224 = vmatmul.mubr.msk.bf16.vlgmr.msra.gmra.mrb[44].mxu0 %vm261_vm5, %v2222_v57  ;;  %2229 = vmatprep.subr.msk.bf16.mxu0 %vm265_vm3, %v1879_v59  ;;  %v1884_v2 = vsel %vm265_vm3, %v1878_v58, 0  ;;  %v1997_v11 = vpop.permute.xlu1 %1996 }
 0x3a6   : > { %1890 = vmatpush1.bf16.msra.mxu0 %v1884_v2  ;;  %1921 = vmatprep.mubr.bf16.mxu0 %v2274_v1 }
 0x3a7   : > { %v1942_v4 = vpack.c.bf16 %v1938_v62, %v1938_v62  ;;  %v1943_v7 = vpack.c.bf16 %v1939_v63, %v1939_v63  ;;  %v1999_v12 = vpop.permute.xlu0 %1998 }
 0x3a8   : > { %v2000_v30 = vsel %vm788_vm9, %v1997_v11, %v1999_v12  ;;  %v2001_v34 = vsel %vm788_vm9, %v1999_v12, %v1997_v11 }
 0x3a9   : > { %v2002_v15 = vmul.f32 %v2532_v45, %v2000_v30  ;;  %v2003_v17 = vmul.f32 %v2537_v46, %v2001_v34  ;;  %2227 = vmatmul.mubr.msk.bf16.vlgmr.msra.gmra.mrb[44].mxu1 %vm261_vm5, %v2225_v3  ;;  %2232 = vmatprep.subr.msk.bf16.mxu1 %vm265_vm3, %v1943_v7  ;;  %v1948_v13 = vsel %vm265_vm3, %v1942_v4, 0  ;;  %v2231_v46 = vld [vmem:[%s2903_s0 + $0x19] sm:$0x1] }
 0x3aa   : > { %1954 = vmatpush1.bf16.msra.mxu1 %v1948_v13  ;;  %1985 = vmatprep.mubr.bf16.mxu1 %v2274_v1 }
 0x3ab   : > { %v2006_v19 = vpack.c.bf16 %v2002_v15, %v2002_v15  ;;  %v2007_v6 = vpack.c.bf16 %v2003_v17, %v2003_v17 }
 0x3ad   : > { %2230 = vmatmul.mubr.msk.bf16.vlgmr.msra.gmra.mrb[48].mxu0 %vm261_vm5, %v2228_v0  ;;  %2235 = vmatprep.subr.msk.bf16.mxu0 %vm265_vm3, %v2007_v6  ;;  %v2012_v45 = vsel %vm265_vm3, %v2006_v19, 0 }
 0x3ae   : > { %2018 = vmatpush1.bf16.msra.mxu0 %v2012_v45  ;;  %2049 = vmatprep.mubr.bf16.mxu0 %v2274_v1 }
 0x3b1   : > { %2233 = vmatmul.mubr.msk.bf16.vlgmr.msra.gmra.mrb[48].mxu1 %vm261_vm5, %v2231_v46 }
 0x3b5   : > { %2236 = vmatmul.mubr.msk.bf16.vlgmr.msra.gmra.mrb[52].mxu0 %vm261_vm5, %v2234_v22 }
 0x3b6   : > { %v2065_v2 = vpop.permute.xlu1 %2064 }
 0x468   : > { %v1563_v14 = vpop.f32.mrb[36].mxu0 }
 0x469   : > { %v1565_v16 = vpop.f32.mrb[37].mxu0 }
 0x46a   : > { %v1567_v23 = vpop.f32.mrb[38].mxu0 }
 0x46b   : > { %v1568_v24 = vpop.f32.mrb[39].mxu0 }
 0x46c   : > { %v1613_v25 = vpop.f32.mrb[36].mxu1 }
 0x46d   : > { %v1614_v26 = vadd.f32 %v1613_v25, %v1563_v14  ;;  %v1615_v27 = vpop.f32.mrb[37].mxu1 }
 0x46e   : > { %v1616_v28 = vadd.f32 %v1615_v27, %v1565_v16  ;;  %v1617_v31 = vpop.f32.mrb[38].mxu1 }
 0x46f   : > { %v1618_v20 = vpop.f32.mrb[39].mxu1 }
 0x470   : > { %v1675_v21 = vpop.f32.mrb[40].mxu0 }
 0x471   : > { %v1682_v1 = vadd.f32 %v1675_v21, %v1614_v26  ;;  %v1677_v32 = vpop.f32.mrb[41].mxu0 }
 0x472   : > { %v1683_v33 = vadd.f32 %v1677_v32, %v1616_v28  ;;  %v1679_v35 = vpop.f32.mrb[42].mxu0 }
 0x473   : > { %v1680_v36 = vpop.f32.mrb[43].mxu0 }
 0x474   : > { %v1739_v9 = vpop.f32.mrb[40].mxu1 }
 0x475   : > { %v1746_v37 = vadd.f32 %v1739_v9, %v1682_v1  ;;  %v1741_v38 = vpop.f32.mrb[41].mxu1 }
 0x476   : > { %v1747_v40 = vadd.f32 %v1741_v38, %v1683_v33  ;;  %v1743_v5 = vpop.f32.mrb[42].mxu1 }
 0x477   : > { %v1744_v41 = vpop.f32.mrb[43].mxu1 }
 0x478   : > { %v1795_v39 = vpop.f32.mrb[44].mxu0 }
 0x479   : > { %v1802_v10 = vadd.f32 %v1795_v39, %v1746_v37  ;;  %v1797_v42 = vpop.f32.mrb[45].mxu0 }
 0x47a   : > { %v1803_v43 = vadd.f32 %v1797_v42, %v1747_v40  ;;  %v1799_v44 = vpop.f32.mrb[46].mxu0 }
 0x47b   : > { %v1800_v47 = vpop.f32.mrb[47].mxu0 }
 0x47c   : > { %v1859_v48 = vpop.f32.mrb[44].mxu1 }
 0x47d   : > { %v1866_v49 = vadd.f32 %v1859_v48, %v1802_v10  ;;  %v1861_v50 = vpop.f32.mrb[45].mxu1 }
 0x47e   : > { %v1867_v51 = vadd.f32 %v1861_v50, %v1803_v43  ;;  %v1863_v52 = vpop.f32.mrb[46].mxu1 }
 0x47f   : > { %v1864_v60 = vpop.f32.mrb[47].mxu1 }
 0x480   : > { %v1923_v53 = vpop.f32.mrb[48].mxu0 }
 0x481   : > { %v1930_v29 = vadd.f32 %v1923_v53, %v1866_v49  ;;  %v1925_v54 = vpop.f32.mrb[49].mxu0 }
 0x482   : > { %v1931_v55 = vadd.f32 %v1925_v54, %v1867_v51  ;;  %v1927_v56 = vpop.f32.mrb[50].mxu0 }
 0x483   : > { %v1928_v57 = vpop.f32.mrb[51].mxu0 }
 0x484   : > { %v1987_v58 = vpop.f32.mrb[48].mxu1 }
 0x485   : > { %v1994_v59 = vadd.f32 %v1987_v58, %v1930_v29  ;;  %v1989_v61 = vpop.f32.mrb[49].mxu1 }
 0x486   : > { %v1995_v8 = vadd.f32 %v1989_v61, %v1931_v55  ;;  %v1991_v18 = vpop.f32.mrb[50].mxu1 }
 0x487   : > { %v1992_v62 = vpop.f32.mrb[51].mxu1 }
 0x488   : > { %v2051_v63 = vpop.f32.mrb[52].mxu0 }
 0x489   : > { %v2058_v3 = vadd.f32 %v2051_v63, %v1994_v59  ;;  %v2053_v4 = vpop.f32.mrb[53].mxu0 }
 0x48a   : > { %v2059_v7 = vadd.f32 %v2053_v4, %v1995_v8  ;;  %v2055_v11 = vpop.f32.mrb[54].mxu0 }
 0x48b   : > { %v2067_v12 = vadd.f32 %v2065_v2, %v2058_v3  ;;  %v2056_v30 = vpop.f32.mrb[55].mxu0 }
 0x48c   : > { %v2068_v34 = vadd.f32 %v2065_v2, %v2059_v7 }
 0x48d   : > { %v2069_v15 = vmax.f32 %v2067_v12, 0.0 }
 0x48e   : > { %v2070_v17 = vmax.f32 %v2068_v34, 0.0 }
 0x490   : > { %v2073_v13 = vcombine.low %v2069_v15, %v2070_v17 }
 0x492   : > { %2245 = vst.sshfl [vmem:[%s2574_s5 + $0xc] sm:$0x33 pattern:$0x76325410] %v2073_v13 }
 0x493 PF: > { %s14_s15 = sadd.s32 1, %s2272_s15  }
 0x494   : > { %p11_p4 = scmp.ge.s32.totalorder %s14_s15, 4  }
 0x496   :  { %13 = sbr.rel (!%p11_p4) target bundleno = 1 (0x1), region = 100 }

</bundles_post_ra>
